<compile_context>
chip_gen: v6e
topology: v6e:2x2x1
jax: 0.10.0
libtpu: 0.0.40
codegen_flags: <defaults>
</compile_context>

<pallas_src>
import math
import functools

import jax
import jax.numpy as jnp
from jax.experimental import pallas as pl
from jax.experimental.pallas import tpu as pltpu

# ----------------------------- small GPT-2 config -----------------------------
CONFIG = dict(
    vocab_size=128,
    hidden_size=32,
    n_layer=2,
    n_head=2,
    n_positions=32,
    pad_token_id=0,
)
LN_EPS = 1e-5
GELU_C = 0.7978845608028654  # sqrt(2/pi)
NEG_INF = -1e30              # keep causal mask / softmax math in f32
VMEM_LIMIT = 32 * 1024 * 1024


def _layernorm(x, g, b):
    """f32 layernorm over the last (lane) dim."""
    mu = jnp.mean(x, axis=-1, keepdims=True)
    var = jnp.mean((x - mu) * (x - mu), axis=-1, keepdims=True)
    return (x - mu) * jax.lax.rsqrt(var + LN_EPS) * g + b


# ---------------------- fused transformer-blocks kernel ------------------------
def _make_blocks_kernel(B, S, H, n_head):
    M = B * S
    hd = H // n_head
    scale = 1.0 / math.sqrt(hd)

    def kernel(x_ref, ln1g_ref, ln1b_ref, caw_ref, cab_ref, apw_ref, apb_ref,
               ln2g_ref, ln2b_ref, cfw_ref, cfb_ref, mpw_ref, mpb_ref,
               o_ref, attn_scratch):
        layer = pl.program_id(0)

        # residual stream lives in the (resident) output block across layers
        @pl.when(layer == 0)
        def _():
            o_ref[...] = x_ref[...]

        x = o_ref[...]                                   # (M, H) f32

        # ---- attention sub-block (LN1 fused in) ----
        h1 = _layernorm(x, ln1g_ref[0], ln1b_ref[0])
        qkv = jnp.dot(h1.astype(jnp.bfloat16), caw_ref[0],
                      preferred_element_type=jnp.float32) + cab_ref[0]   # (M, 3H) f32
        q = qkv[:, :H].reshape(B, S, H)
        k = qkv[:, H:2 * H].reshape(B, S, H)
        v = qkv[:, 2 * H:].reshape(B, S, H)

        row = jax.lax.broadcasted_iota(jnp.int32, (B, S, S), 1)
        col = jax.lax.broadcasted_iota(jnp.int32, (B, S, S), 2)
        causal = col <= row

        # all batches processed together per head (batched einsum on the MXU)
        for h in range(n_head):
            lo, hi = h * hd, (h + 1) * hd
            qh = q[:, :, lo:hi].astype(jnp.bfloat16)
            kh = k[:, :, lo:hi].astype(jnp.bfloat16)
            vh = v[:, :, lo:hi].astype(jnp.bfloat16)
            s = jnp.einsum('bqd,bkd->bqk', qh, kh,
                           preferred_element_type=jnp.float32) * scale    # (B,S,S) f32
            s = jnp.where(causal, s, NEG_INF)
            s = s - jnp.max(s, axis=-1, keepdims=True)
            p = jnp.exp(s)
            p = p * pl.reciprocal(jnp.sum(p, axis=-1, keepdims=True), approx=False)
            oh = jnp.einsum('bqk,bkd->bqd', p.astype(jnp.bfloat16), vh,
                            preferred_element_type=jnp.float32)           # (B,S,hd)
            attn_scratch[:, :, lo:hi] = oh

        a = attn_scratch[...].reshape(M, H)
        x = x + (jnp.dot(a.astype(jnp.bfloat16), apw_ref[0],
                         preferred_element_type=jnp.float32) + apb_ref[0])

        # ---- MLP sub-block (LN2 fused in, gelu_new in f32) ----
        h2 = _layernorm(x, ln2g_ref[0], ln2b_ref[0])
        m = jnp.dot(h2.astype(jnp.bfloat16), cfw_ref[0],
                    preferred_element_type=jnp.float32) + cfb_ref[0]
        m = 0.5 * m * (1.0 + jnp.tanh(GELU_C * (m + 0.044715 * m * m * m)))
        x = x + (jnp.dot(m.astype(jnp.bfloat16), mpw_ref[0],
                         preferred_element_type=jnp.float32) + mpb_ref[0])

        o_ref[...] = x

    return kernel


def gpt2_blocks(x, p, *, B, S, H, n_head, n_layer):
    """Run every transformer block in a single pallas_call, grid = (n_layer,)."""
    M = B * S

    def lspec(*dims):
        zeros = (0,) * len(dims)
        return pl.BlockSpec((1,) + dims, lambda l: (l,) + zeros)

    x_spec = pl.BlockSpec((M, H), lambda l: (0, 0))

    return pl.pallas_call(
        _make_blocks_kernel(B, S, H, n_head),
        grid=(n_layer,),
        in_specs=[
            x_spec,
            lspec(1, H), lspec(1, H),            # ln1 gamma / beta
            lspec(H, 3 * H), lspec(1, 3 * H),    # c_attn w / b
            lspec(H, H), lspec(1, H),            # attn proj w / b
            lspec(1, H), lspec(1, H),            # ln2 gamma / beta
            lspec(H, 4 * H), lspec(1, 4 * H),    # c_fc w / b
            lspec(4 * H, H), lspec(1, H),        # mlp proj w / b
        ],
        out_specs=pl.BlockSpec((M, H), lambda l: (0, 0)),   # resident across layers
        out_shape=jax.ShapeDtypeStruct((M, H), jnp.float32),
        scratch_shapes=[pltpu.VMEM((B, S, H), jnp.float32)],
        compiler_params=pltpu.CompilerParams(
            dimension_semantics=("arbitrary",),
            vmem_limit_bytes=VMEM_LIMIT),
    )(x,
      p["ln1_g"], p["ln1_b"],
      p["c_attn_w"], p["c_attn_b"],
      p["attn_proj_w"], p["attn_proj_b"],
      p["ln2_g"], p["ln2_b"],
      p["c_fc_w"], p["c_fc_b"],
      p["mlp_proj_w"], p["mlp_proj_b"])


# ----------------- fused final-LN + tied LM head + loss/acc kernel --------------
def _make_head_loss_kernel(M, V):
    def kernel(x_ref, g_ref, b_ref, wte_ref, lbl_ref, msk_ref, o_ref):
        hf = _layernorm(x_ref[...], g_ref[...], b_ref[...])          # (M, H) f32
        # tied LM head: logits = hf @ wte.T ; wte passed UNtransposed, contract on H
        logits = jax.lax.dot_general(
            hf.astype(jnp.bfloat16), wte_ref[...],
            (((1,), (1,)), ((), ())),
            preferred_element_type=jnp.float32)                      # (M, V), VMEM only
        labels = lbl_ref[...]                                        # (M, 1) int32
        masks = msk_ref[...]                                         # (M, 1) f32
        mx = jnp.max(logits, axis=-1, keepdims=True)
        lse = mx + jnp.log(jnp.sum(jnp.exp(logits - mx), axis=-1, keepdims=True))
        col = jax.lax.broadcasted_iota(jnp.int32, (M, V), 1)
        onehot = (col == labels).astype(jnp.float32)
        lbl_logit = jnp.sum(logits * onehot, axis=-1, keepdims=True)
        valid = (labels != -100).astype(jnp.float32)
        # argmax (first max index) matches torch.max tie behavior
        is_max = logits == mx
        first_idx = jnp.min(jnp.where(is_max, col, V), axis=-1, keepdims=True)
        o_ref[0] = jnp.sum((lse - lbl_logit) * valid)                # CE numerator
        o_ref[1] = jnp.sum(valid)                                    # CE denominator
        o_ref[2] = jnp.sum((first_idx == labels).astype(jnp.float32) * masks)
        o_ref[3] = jnp.sum(masks)
    return kernel


def head_and_loss(x, lnf_g, lnf_b, wte_bf16, labels, masks):
    M, _ = x.shape
    V = wte_bf16.shape[0]
    return pl.pallas_call(
        _make_head_loss_kernel(M, V),
        out_shape=jax.ShapeDtypeStruct((4,), jnp.float32),
        out_specs=pl.BlockSpec(memory_space=pltpu.SMEM),
        compiler_params=pltpu.CompilerParams(vmem_limit_bytes=VMEM_LIMIT),
    )(x, lnf_g, lnf_b, wte_bf16, labels, masks)


# ------------------------------ parameter init ---------------------------------
def init_params(key, cfg):
    V, H, NL = cfg["vocab_size"], cfg["hidden_size"], cfg["n_layer"]
    std = 0.02
    keys = jax.random.split(key, 6)

    def nrm(k, shape):
        return jax.random.normal(k, shape, jnp.float32) * std

    # matmul weights stored bf16 (MXU-native); biases / LN params / embeddings f32
    return {
        "wte": nrm(keys[0], (V, H)),
        "wpe": nrm(keys[1], (cfg["n_positions"], H)),
        "lnf_g": jnp.ones((1, H), jnp.float32),
        "lnf_b": jnp.zeros((1, H), jnp.float32),
        "ln1_g": jnp.ones((NL, 1, H), jnp.float32),
        "ln1_b": jnp.zeros((NL, 1, H), jnp.float32),
        "c_attn_w": nrm(keys[2], (NL, H, 3 * H)).astype(jnp.bfloat16),
        "c_attn_b": jnp.zeros((NL, 1, 3 * H), jnp.float32),
        "attn_proj_w": nrm(keys[3], (NL, H, H)).astype(jnp.bfloat16),
        "attn_proj_b": jnp.zeros((NL, 1, H), jnp.float32),
        "ln2_g": jnp.ones((NL, 1, H), jnp.float32),
        "ln2_b": jnp.zeros((NL, 1, H), jnp.float32),
        "c_fc_w": nrm(keys[4], (NL, H, 4 * H)).astype(jnp.bfloat16),
        "c_fc_b": jnp.zeros((NL, 1, 4 * H), jnp.float32),
        "mlp_proj_w": nrm(keys[5], (NL, 4 * H, H)).astype(jnp.bfloat16),
        "mlp_proj_b": jnp.zeros((NL, 1, H), jnp.float32),
    }


# ----------------------------- TRIPDialGPT2 forward ----------------------------
@functools.partial(jax.jit, static_argnames=("n_head", "n_layer", "pad_token_id"))
def trip_dial_gpt2_forward(params, input_ids, lm_labels, *, n_head, n_layer,
                           pad_token_id):
    B, S = input_ids.shape
    V, H = params["wte"].shape

    # label masking (module semantics)
    lm_labels = jnp.where(lm_labels == pad_token_id, -100, lm_labels)
    label_masks = jnp.where(lm_labels == -100, 0, lm_labels)
    label_masks = jnp.where(label_masks > 0, 1, label_masks).astype(jnp.float32)

    # embeddings (gather = glue)
    pos = jnp.arange(S)
    h = params["wte"][input_ids] + params["wpe"][pos][None, :, :]
    x = h.reshape(B * S, H).astype(jnp.float32)

    # all transformer blocks in one fused pallas_call (layer index = grid axis)
    x = gpt2_blocks(x, params, B=B, S=S, H=H, n_head=n_head, n_layer=n_layer)

    # per-row shifted labels/masks: row (b, s) is scored against token (b, s+1);
    # the last position of every sequence is ignored (label -100 / mask 0).
    shift_labels = jnp.concatenate(
        [lm_labels[:, 1:], jnp.full((B, 1), -100, lm_labels.dtype)], axis=1)
    shift_masks = jnp.concatenate(
        [label_masks[:, 1:], jnp.zeros((B, 1), jnp.float32)], axis=1)
    labels2 = shift_labels.reshape(B * S, 1).astype(jnp.int32)
    masks2 = shift_masks.reshape(B * S, 1)

    # fused final LN + tied LM head + CE loss + accuracy; logits never hit HBM
    stats = head_and_loss(x, params["lnf_g"], params["lnf_b"],
                          params["wte"].astype(jnp.bfloat16), labels2, masks2)
    lm_loss = jnp.where(stats[1] > 0, stats[0] / jnp.maximum(stats[1], 1.0), 0.0)
    acc = jnp.where(stats[3] > 0, stats[2] / jnp.maximum(stats[3], 1.0), 0.0)

    return {"loss": lm_loss, "lm_loss": lm_loss, "acc": acc}


# ------------------------------------ main --------------------------------------
if __name__ == "__main__":
    cfg = CONFIG
    key = jax.random.PRNGKey(0)
    k_param, k_ids = jax.random.split(key)

    params = init_params(k_param, cfg)

    B, S = 2, 8
    input_ids = jax.random.randint(k_ids, (B, S), 1, cfg["vocab_size"], dtype=jnp.int32)
    # put a couple of pad tokens at the tail of each sequence
    input_ids = input_ids.at[:, -2:].set(cfg["pad_token_id"])
    lm_labels = input_ids  # standard LM setup: labels == inputs (pads masked inside)

    out = trip_dial_gpt2_forward(
        params, input_ids, lm_labels,
        n_head=cfg["n_head"], n_layer=cfg["n_layer"],
        pad_token_id=cfg["pad_token_id"])
    jax.block_until_ready(out)

    assert jnp.isfinite(out["loss"])
    assert jnp.isfinite(out["lm_loss"])
    assert 0.0 <= float(out["acc"]) <= 1.0
    print("KERNEL_OK")
</pallas_src>

<mosaic_0001>
module attributes {stable_mosaic.version = 11 : i64} {
  func.func @kernel(%arg0: memref<16x32xf32, #tpu.memory_space<vmem>>, %arg1: memref<1x32xf32, #tpu.memory_space<vmem>>, %arg2: memref<1x32xf32, #tpu.memory_space<vmem>>, %arg3: memref<128x32xbf16, #tpu.memory_space<vmem>>, %arg4: memref<16x1xi32, #tpu.memory_space<vmem>>, %arg5: memref<16x1xf32, #tpu.memory_space<vmem>>, %arg6: memref<4xf32, #tpu.memory_space<smem>>) attributes {dimension_semantics = [], scalar_prefetch = 0 : i64, scratch_operands = 0 : i64, tpu.core_type = #tpu.core_type<tc>} {
    %c0 = arith.constant 0 : index
    %c0_0 = arith.constant 0 : index
    %0 = vector.load %arg0[%c0, %c0_0] : memref<16x32xf32, #tpu.memory_space<vmem>>, vector<16x32xf32>
    %c0_1 = arith.constant 0 : index
    %c0_2 = arith.constant 0 : index
    %1 = vector.load %arg1[%c0_1, %c0_2] : memref<1x32xf32, #tpu.memory_space<vmem>>, vector<1x32xf32>
    %c0_3 = arith.constant 0 : index
    %c0_4 = arith.constant 0 : index
    %2 = vector.load %arg2[%c0_3, %c0_4] : memref<1x32xf32, #tpu.memory_space<vmem>>, vector<1x32xf32>
    %cst = arith.constant dense<0.000000e+00> : vector<16xf32>
    %3 = vector.multi_reduction <add>, %0, %cst [1] : vector<16x32xf32> to vector<16xf32>
    %4 = vector.shape_cast %3 : vector<16xf32> to vector<16x1xf32>
    %cst_5 = arith.constant 3.200000e+01 : f32
    %5 = vector.broadcast %cst_5 : f32 to vector<16x1xf32>
    %6 = arith.divf %4, %5 : vector<16x1xf32>
    %7 = vector.broadcast %6 : vector<16x1xf32> to vector<16x32xf32>
    %8 = arith.subf %0, %7 : vector<16x32xf32>
    %9 = vector.broadcast %6 : vector<16x1xf32> to vector<16x32xf32>
    %10 = arith.subf %0, %9 : vector<16x32xf32>
    %11 = arith.mulf %8, %10 : vector<16x32xf32>
    %cst_6 = arith.constant dense<0.000000e+00> : vector<16xf32>
    %12 = vector.multi_reduction <add>, %11, %cst_6 [1] : vector<16x32xf32> to vector<16xf32>
    %13 = vector.shape_cast %12 : vector<16xf32> to vector<16x1xf32>
    %cst_7 = arith.constant 3.200000e+01 : f32
    %14 = vector.broadcast %cst_7 : f32 to vector<16x1xf32>
    %15 = arith.divf %13, %14 : vector<16x1xf32>
    %16 = vector.broadcast %6 : vector<16x1xf32> to vector<16x32xf32>
    %17 = arith.subf %0, %16 : vector<16x32xf32>
    %cst_8 = arith.constant 9.99999974E-6 : f32
    %18 = vector.broadcast %cst_8 : f32 to vector<16x1xf32>
    %19 = arith.addf %15, %18 : vector<16x1xf32>
    %20 = math.rsqrt %19 : vector<16x1xf32>
    %21 = vector.broadcast %20 : vector<16x1xf32> to vector<16x32xf32>
    %22 = arith.mulf %17, %21 : vector<16x32xf32>
    %23 = vector.broadcast %1 : vector<1x32xf32> to vector<16x32xf32>
    %24 = arith.mulf %22, %23 : vector<16x32xf32>
    %25 = vector.broadcast %2 : vector<1x32xf32> to vector<16x32xf32>
    %26 = arith.addf %24, %25 : vector<16x32xf32>
    %27 = arith.truncf %26 : vector<16x32xf32> to vector<16x32xbf16>
    %c0_9 = arith.constant 0 : index
    %c0_10 = arith.constant 0 : index
    %28 = vector.load %arg3[%c0_9, %c0_10] : memref<128x32xbf16, #tpu.memory_space<vmem>>, vector<128x32xbf16>
    %cst_11 = arith.constant dense<0.000000e+00> : vector<16x128xf32>
    %29 = tpu.matmul %27, %28, %cst_11 {dimension_numbers = #tpu.dot_dimension_numbers<[1], [1], [0], [0], [0, 0, 1, 0], [], []>} : vector<16x32xbf16>, vector<128x32xbf16>, vector<16x128xf32> -> vector<16x128xf32>
    %c0_12 = arith.constant 0 : index
    %c0_13 = arith.constant 0 : index
    %30 = vector.load %arg4[%c0_12, %c0_13] : memref<16x1xi32, #tpu.memory_space<vmem>>, vector<16x1xi32>
    %c0_14 = arith.constant 0 : index
    %c0_15 = arith.constant 0 : index
    %31 = vector.load %arg5[%c0_14, %c0_15] : memref<16x1xf32, #tpu.memory_space<vmem>>, vector<16x1xf32>
    %cst_16 = arith.constant dense<0xFF800000> : vector<16xf32>
    %32 = vector.multi_reduction <maximumf>, %29, %cst_16 [1] : vector<16x128xf32> to vector<16xf32>
    %33 = vector.shape_cast %32 : vector<16xf32> to vector<16x1xf32>
    %34 = vector.broadcast %33 : vector<16x1xf32> to vector<16x128xf32>
    %35 = arith.subf %29, %34 : vector<16x128xf32>
    %36 = math.exp %35 : vector<16x128xf32>
    %cst_17 = arith.constant dense<0.000000e+00> : vector<16xf32>
    %37 = vector.multi_reduction <add>, %36, %cst_17 [1] : vector<16x128xf32> to vector<16xf32>
    %38 = vector.shape_cast %37 : vector<16xf32> to vector<16x1xf32>
    %39 = math.log %38 : vector<16x1xf32>
    %40 = arith.addf %33, %39 : vector<16x1xf32>
    %41 = tpu.iota {dimensions = array<i32: 1>} : vector<16x128xi32>
    %42 = vector.broadcast %30 : vector<16x1xi32> to vector<16x128xi32>
    %43 = arith.cmpi eq, %41, %42 : vector<16x128xi32>
    %44 = arith.extui %43 : vector<16x128xi1> to vector<16x128xi32>
    %45 = arith.sitofp %44 : vector<16x128xi32> to vector<16x128xf32>
    %46 = arith.mulf %29, %45 : vector<16x128xf32>
    %cst_18 = arith.constant dense<0.000000e+00> : vector<16xf32>
    %47 = vector.multi_reduction <add>, %46, %cst_18 [1] : vector<16x128xf32> to vector<16xf32>
    %48 = vector.shape_cast %47 : vector<16xf32> to vector<16x1xf32>
    %c-100_i32 = arith.constant -100 : i32
    %49 = vector.broadcast %c-100_i32 : i32 to vector<16x1xi32>
    %50 = arith.cmpi ne, %30, %49 : vector<16x1xi32>
    %51 = arith.extui %50 : vector<16x1xi1> to vector<16x1xi32>
    %52 = arith.sitofp %51 : vector<16x1xi32> to vector<16x1xf32>
    %53 = vector.broadcast %33 : vector<16x1xf32> to vector<16x128xf32>
    %54 = arith.cmpf oeq, %29, %53 : vector<16x128xf32>
    %c128_i32 = arith.constant 128 : i32
    %55 = vector.broadcast %c128_i32 : i32 to vector<16x128xi32>
    %56 = arith.select %54, %41, %55 : vector<16x128xi1>, vector<16x128xi32>
    %cst_19 = arith.constant dense<2147483647> : vector<16xi32>
    %57 = vector.multi_reduction <minsi>, %56, %cst_19 [1] : vector<16x128xi32> to vector<16xi32>
    %58 = vector.shape_cast %57 : vector<16xi32> to vector<16x1xi32>
    %59 = arith.subf %40, %48 : vector<16x1xf32>
    %60 = arith.mulf %59, %52 : vector<16x1xf32>
    %61 = vector.shape_cast %60 : vector<16x1xf32> to vector<1x16x1xf32>
    %cst_20 = arith.constant dense<0.000000e+00> : vector<1xf32>
    %62 = vector.multi_reduction <add>, %61, %cst_20 [1, 2] : vector<1x16x1xf32> to vector<1xf32>
    %63 = vector.shape_cast %62 : vector<1xf32> to vector<1x1x1xf32>
    %64 = vector.extract %63[0, 0, 0] : f32 from vector<1x1x1xf32>
    %c0_21 = arith.constant 0 : index
    %65 = memref.load %arg6[%c0_21] : memref<4xf32, #tpu.memory_space<smem>>
    memref.store %64, %arg6[%c0_21] : memref<4xf32, #tpu.memory_space<smem>>
    %66 = vector.shape_cast %52 : vector<16x1xf32> to vector<1x16x1xf32>
    %cst_22 = arith.constant dense<0.000000e+00> : vector<1xf32>
    %67 = vector.multi_reduction <add>, %66, %cst_22 [1, 2] : vector<1x16x1xf32> to vector<1xf32>
    %68 = vector.shape_cast %67 : vector<1xf32> to vector<1x1x1xf32>
    %69 = vector.extract %68[0, 0, 0] : f32 from vector<1x1x1xf32>
    %c1 = arith.constant 1 : index
    %70 = memref.load %arg6[%c1] : memref<4xf32, #tpu.memory_space<smem>>
    memref.store %69, %arg6[%c1] : memref<4xf32, #tpu.memory_space<smem>>
    %71 = arith.cmpi eq, %58, %30 : vector<16x1xi32>
    %72 = arith.extui %71 : vector<16x1xi1> to vector<16x1xi32>
    %73 = arith.sitofp %72 : vector<16x1xi32> to vector<16x1xf32>
    %74 = arith.mulf %73, %31 : vector<16x1xf32>
    %75 = vector.shape_cast %74 : vector<16x1xf32> to vector<1x16x1xf32>
    %cst_23 = arith.constant dense<0.000000e+00> : vector<1xf32>
    %76 = vector.multi_reduction <add>, %75, %cst_23 [1, 2] : vector<1x16x1xf32> to vector<1xf32>
    %77 = vector.shape_cast %76 : vector<1xf32> to vector<1x1x1xf32>
    %78 = vector.extract %77[0, 0, 0] : f32 from vector<1x1x1xf32>
    %c2 = arith.constant 2 : index
    %79 = memref.load %arg6[%c2] : memref<4xf32, #tpu.memory_space<smem>>
    memref.store %78, %arg6[%c2] : memref<4xf32, #tpu.memory_space<smem>>
    %80 = vector.shape_cast %31 : vector<16x1xf32> to vector<1x16x1xf32>
    %cst_24 = arith.constant dense<0.000000e+00> : vector<1xf32>
    %81 = vector.multi_reduction <add>, %80, %cst_24 [1, 2] : vector<1x16x1xf32> to vector<1xf32>
    %82 = vector.shape_cast %81 : vector<1xf32> to vector<1x1x1xf32>
    %83 = vector.extract %82[0, 0, 0] : f32 from vector<1x1x1xf32>
    %c3 = arith.constant 3 : index
    %84 = memref.load %arg6[%c3] : memref<4xf32, #tpu.memory_space<smem>>
    memref.store %83, %arg6[%c3] : memref<4xf32, #tpu.memory_space<smem>>
    return
  }
}

module attributes {stable_mosaic.version = 11 : i64} {
  func.func @kernel(%arg0: i32, %arg1: memref<16x32xf32, #tpu.memory_space<vmem>>, %arg2: memref<1x1x32xf32, #tpu.memory_space<vmem>>, %arg3: memref<1x1x32xf32, #tpu.memory_space<vmem>>, %arg4: memref<1x32x96xbf16, #tpu.memory_space<vmem>>, %arg5: memref<1x1x96xf32, #tpu.memory_space<vmem>>, %arg6: memref<1x32x32xbf16, #tpu.memory_space<vmem>>, %arg7: memref<1x1x32xf32, #tpu.memory_space<vmem>>, %arg8: memref<1x1x32xf32, #tpu.memory_space<vmem>>, %arg9: memref<1x1x32xf32, #tpu.memory_space<vmem>>, %arg10: memref<1x32x128xbf16, #tpu.memory_space<vmem>>, %arg11: memref<1x1x128xf32, #tpu.memory_space<vmem>>, %arg12: memref<1x128x32xbf16, #tpu.memory_space<vmem>>, %arg13: memref<1x1x32xf32, #tpu.memory_space<vmem>>, %arg14: memref<16x32xf32, #tpu.memory_space<vmem>>, %arg15: memref<2x8x32xf32, #tpu.memory_space<vmem>>) attributes {dimension_semantics = [#tpu.dimension_semantics<arbitrary>], iteration_bounds = array<i64: 2>, scalar_prefetch = 0 : i64, scratch_operands = 1 : i64, tpu.core_type = #tpu.core_type<tc>, window_params = [{pipeline_mode = #tpu.pipeline_mode<synchronous>, transform_indices = @transform_0, window_bounds = array<i64: 16, 32>}, {transform_indices = @transform_1, window_bounds = array<i64: 1, 1, 32>}, {transform_indices = @transform_2, window_bounds = array<i64: 1, 1, 32>}, {transform_indices = @transform_3, window_bounds = array<i64: 1, 32, 96>}, {transform_indices = @transform_4, window_bounds = array<i64: 1, 1, 96>}, {transform_indices = @transform_5, window_bounds = array<i64: 1, 32, 32>}, {transform_indices = @transform_6, window_bounds = array<i64: 1, 1, 32>}, {transform_indices = @transform_7, window_bounds = array<i64: 1, 1, 32>}, {transform_indices = @transform_8, window_bounds = array<i64: 1, 1, 32>}, {transform_indices = @transform_9, window_bounds = array<i64: 1, 32, 128>}, {transform_indices = @transform_10, window_bounds = array<i64: 1, 1, 128>}, {transform_indices = @transform_11, window_bounds = array<i64: 1, 128, 32>}, {transform_indices = @transform_12, window_bounds = array<i64: 1, 1, 32>}, {pipeline_mode = #tpu.pipeline_mode<synchronous>, transform_indices = @transform_13, window_bounds = array<i64: 16, 32>}]} {
    %c0_i32 = arith.constant 0 : i32
    %0 = arith.cmpi eq, %arg0, %c0_i32 : i32
    %1 = arith.extui %0 : i1 to i32
    %c0_i32_0 = arith.constant 0 : i32
    %2 = arith.cmpi ne, %1, %c0_i32_0 : i32
    scf.if %2 {
      %c0_77 = arith.constant 0 : index
      %c0_78 = arith.constant 0 : index
      %167 = vector.load %arg1[%c0_77, %c0_78] : memref<16x32xf32, #tpu.memory_space<vmem>>, vector<16x32xf32>
      %c0_79 = arith.constant 0 : index
      %c0_80 = arith.constant 0 : index
      %168 = vector.load %arg14[%c0_79, %c0_80] : memref<16x32xf32, #tpu.memory_space<vmem>>, vector<16x32xf32>
      tpu.vector_store %arg14[%c0_79, %c0_80], %167 {strides = array<i32>} : memref<16x32xf32, #tpu.memory_space<vmem>>, vector<16x32xf32>,
    } else {
    }
    %c0 = arith.constant 0 : index
    %c0_1 = arith.constant 0 : index
    %3 = vector.load %arg14[%c0, %c0_1] : memref<16x32xf32, #tpu.memory_space<vmem>>, vector<16x32xf32>
    %c0_2 = arith.constant 0 : index
    %c0_3 = arith.constant 0 : index
    %c0_4 = arith.constant 0 : index
    %4 = vector.load %arg2[%c0_2, %c0_3, %c0_4] : memref<1x1x32xf32, #tpu.memory_space<vmem>>, vector<1x1x32xf32>
    %5 = vector.shape_cast %4 : vector<1x1x32xf32> to vector<1x32xf32>
    %c0_5 = arith.constant 0 : index
    %c0_6 = arith.constant 0 : index
    %c0_7 = arith.constant 0 : index
    %6 = vector.load %arg3[%c0_5, %c0_6, %c0_7] : memref<1x1x32xf32, #tpu.memory_space<vmem>>, vector<1x1x32xf32>
    %7 = vector.shape_cast %6 : vector<1x1x32xf32> to vector<1x32xf32>
    %cst = arith.constant dense<0.000000e+00> : vector<16xf32>
    %8 = vector.multi_reduction <add>, %3, %cst [1] : vector<16x32xf32> to vector<16xf32>
    %9 = vector.shape_cast %8 : vector<16xf32> to vector<16x1xf32>
    %cst_8 = arith.constant 3.200000e+01 : f32
    %10 = vector.broadcast %cst_8 : f32 to vector<16x1xf32>
    %11 = arith.divf %9, %10 : vector<16x1xf32>
    %12 = vector.broadcast %11 : vector<16x1xf32> to vector<16x32xf32>
    %13 = arith.subf %3, %12 : vector<16x32xf32>
    %14 = vector.broadcast %11 : vector<16x1xf32> to vector<16x32xf32>
    %15 = arith.subf %3, %14 : vector<16x32xf32>
    %16 = arith.mulf %13, %15 : vector<16x32xf32>
    %cst_9 = arith.constant dense<0.000000e+00> : vector<16xf32>
    %17 = vector.multi_reduction <add>, %16, %cst_9 [1] : vector<16x32xf32> to vector<16xf32>
    %18 = vector.shape_cast %17 : vector<16xf32> to vector<16x1xf32>
    %cst_10 = arith.constant 3.200000e+01 : f32
    %19 = vector.broadcast %cst_10 : f32 to vector<16x1xf32>
    %20 = arith.divf %18, %19 : vector<16x1xf32>
    %21 = vector.broadcast %11 : vector<16x1xf32> to vector<16x32xf32>
    %22 = arith.subf %3, %21 : vector<16x32xf32>
    %cst_11 = arith.constant 9.99999974E-6 : f32
    %23 = vector.broadcast %cst_11 : f32 to vector<16x1xf32>
    %24 = arith.addf %20, %23 : vector<16x1xf32>
    %25 = math.rsqrt %24 : vector<16x1xf32>
    %26 = vector.broadcast %25 : vector<16x1xf32> to vector<16x32xf32>
    %27 = arith.mulf %22, %26 : vector<16x32xf32>
    %28 = vector.broadcast %5 : vector<1x32xf32> to vector<16x32xf32>
    %29 = arith.mulf %27, %28 : vector<16x32xf32>
    %30 = vector.broadcast %7 : vector<1x32xf32> to vector<16x32xf32>
    %31 = arith.addf %29, %30 : vector<16x32xf32>
    %32 = arith.truncf %31 : vector<16x32xf32> to vector<16x32xbf16>
    %c0_12 = arith.constant 0 : index
    %c0_13 = arith.constant 0 : index
    %c0_14 = arith.constant 0 : index
    %33 = vector.load %arg4[%c0_12, %c0_13, %c0_14] : memref<1x32x96xbf16, #tpu.memory_space<vmem>>, vector<1x32x96xbf16>
    %34 = vector.shape_cast %33 : vector<1x32x96xbf16> to vector<32x96xbf16>
    %cst_15 = arith.constant dense<0.000000e+00> : vector<16x96xf32>
    %35 = tpu.matmul %32, %34, %cst_15 {dimension_numbers = #tpu.dot_dimension_numbers<[1], [0], [0], [1], [0, 0, 1, 1], [], []>} : vector<16x32xbf16>, vector<32x96xbf16>, vector<16x96xf32> -> vector<16x96xf32>
    %c0_16 = arith.constant 0 : index
    %c0_17 = arith.constant 0 : index
    %c0_18 = arith.constant 0 : index
    %36 = vector.load %arg5[%c0_16, %c0_17, %c0_18] : memref<1x1x96xf32, #tpu.memory_space<vmem>>, vector<1x1x96xf32>
    %37 = vector.shape_cast %36 : vector<1x1x96xf32> to vector<1x96xf32>
    %38 = vector.broadcast %37 : vector<1x96xf32> to vector<16x96xf32>
    %39 = arith.addf %35, %38 : vector<16x96xf32>
    %40 = vector.extract_strided_slice %39 {offsets = [0, 0], sizes = [16, 32], strides = [1, 1]} : vector<16x96xf32> to vector<16x32xf32>
    %41 = vector.shape_cast %40 : vector<16x32xf32> to vector<2x8x32xf32>
    %42 = vector.extract_strided_slice %39 {offsets = [0, 32], sizes = [16, 32], strides = [1, 1]} : vector<16x96xf32> to vector<16x32xf32>
    %43 = vector.shape_cast %42 : vector<16x32xf32> to vector<2x8x32xf32>
    %44 = vector.extract_strided_slice %39 {offsets = [0, 64], sizes = [16, 32], strides = [1, 1]} : vector<16x96xf32> to vector<16x32xf32>
    %45 = vector.shape_cast %44 : vector<16x32xf32> to vector<2x8x32xf32>
    %46 = tpu.iota {dimensions = array<i32: 1>} : vector<2x8x8xi32>
    %47 = tpu.iota {dimensions = array<i32: 2>} : vector<2x8x8xi32>
    %48 = arith.cmpi sle, %47, %46 : vector<2x8x8xi32>
    %49 = vector.extract_strided_slice %41 {offsets = [0, 0, 0], sizes = [2, 8, 16], strides = [1, 1, 1]} : vector<2x8x32xf32> to vector<2x8x16xf32>
    %50 = arith.truncf %49 : vector<2x8x16xf32> to vector<2x8x16xbf16>
    %51 = vector.extract_strided_slice %43 {offsets = [0, 0, 0], sizes = [2, 8, 16], strides = [1, 1, 1]} : vector<2x8x32xf32> to vector<2x8x16xf32>
    %52 = arith.truncf %51 : vector<2x8x16xf32> to vector<2x8x16xbf16>
    %53 = vector.extract_strided_slice %45 {offsets = [0, 0, 0], sizes = [2, 8, 16], strides = [1, 1, 1]} : vector<2x8x32xf32> to vector<2x8x16xf32>
    %54 = arith.truncf %53 : vector<2x8x16xf32> to vector<2x8x16xbf16>
    "tpu.trace_start"() <{level = 10 : i32, message = "bqd,bkd->bqk"}> : () -> ()
    %cst_19 = arith.constant dense<0.000000e+00> : vector<2x8x8xf32>
    %55 = tpu.matmul %50, %52, %cst_19 {dimension_numbers = #tpu.dot_dimension_numbers<[2], [2], [1], [1], [0, 0, 0, 1, 1, 1], [0], [0]>} : vector<2x8x16xbf16>, vector<2x8x16xbf16>, vector<2x8x8xf32> -> vector<2x8x8xf32>
    "tpu.trace_stop"() : () -> ()
    %cst_20 = arith.constant 2.500000e-01 : f32
    %56 = vector.broadcast %cst_20 : f32 to vector<2x8x8xf32>
    %57 = arith.mulf %55, %56 : vector<2x8x8xf32>
    %cst_21 = arith.constant -1.000000e+30 : f32
    %58 = vector.broadcast %cst_21 : f32 to vector<2x8x8xf32>
    %59 = arith.select %48, %57, %58 : vector<2x8x8xi1>, vector<2x8x8xf32>
    %cst_22 = arith.constant dense<0xFF800000> : vector<2x8xf32>
    %60 = vector.multi_reduction <maximumf>, %59, %cst_22 [2] : vector<2x8x8xf32> to vector<2x8xf32>
    %61 = vector.shape_cast %60 : vector<2x8xf32> to vector<2x8x1xf32>
    %62 = vector.broadcast %61 : vector<2x8x1xf32> to vector<2x8x8xf32>
    %63 = arith.subf %59, %62 : vector<2x8x8xf32>
    %64 = math.exp %63 : vector<2x8x8xf32>
    %cst_23 = arith.constant dense<0.000000e+00> : vector<2x8xf32>
    %65 = vector.multi_reduction <add>, %64, %cst_23 [2] : vector<2x8x8xf32> to vector<2x8xf32>
    %66 = vector.shape_cast %65 : vector<2x8xf32> to vector<2x8x1xf32>
    %67 = tpu.reciprocal %66 : vector<2x8x1xf32> -> vector<2x8x1xf32>
    %68 = vector.broadcast %67 : vector<2x8x1xf32> to vector<2x8x8xf32>
    %69 = arith.mulf %64, %68 : vector<2x8x8xf32>
    %70 = arith.truncf %69 : vector<2x8x8xf32> to vector<2x8x8xbf16>
    "tpu.trace_start"() <{level = 10 : i32, message = "bqk,bkd->bqd"}> : () -> ()
    %cst_24 = arith.constant dense<0.000000e+00> : vector<2x8x16xf32>
    %71 = tpu.matmul %70, %54, %cst_24 {dimension_numbers = #tpu.dot_dimension_numbers<[2], [1], [1], [2], [0, 0, 0, 1, 1, 2], [0], [0]>} : vector<2x8x8xbf16>, vector<2x8x16xbf16>, vector<2x8x16xf32> -> vector<2x8x16xf32>
    "tpu.trace_stop"() : () -> ()
    %c0_25 = arith.constant 0 : index
    %c0_26 = arith.constant 0 : index
    %c0_27 = arith.constant 0 : index
    %72 = vector.load %arg15[%c0_25, %c0_26, %c0_27] : memref<2x8x32xf32, #tpu.memory_space<vmem>>, vector<2x8x16xf32>
    tpu.vector_store %arg15[%c0_25, %c0_26, %c0_27], %71 {strides = array<i32>} : memref<2x8x32xf32, #tpu.memory_space<vmem>>, vector<2x8x16xf32>,
    %73 = vector.extract_strided_slice %41 {offsets = [0, 0, 16], sizes = [2, 8, 16], strides = [1, 1, 1]} : vector<2x8x32xf32> to vector<2x8x16xf32>
    %74 = arith.truncf %73 : vector<2x8x16xf32> to vector<2x8x16xbf16>
    %75 = vector.extract_strided_slice %43 {offsets = [0, 0, 16], sizes = [2, 8, 16], strides = [1, 1, 1]} : vector<2x8x32xf32> to vector<2x8x16xf32>
    %76 = arith.truncf %75 : vector<2x8x16xf32> to vector<2x8x16xbf16>
    %77 = vector.extract_strided_slice %45 {offsets = [0, 0, 16], sizes = [2, 8, 16], strides = [1, 1, 1]} : vector<2x8x32xf32> to vector<2x8x16xf32>
    %78 = arith.truncf %77 : vector<2x8x16xf32> to vector<2x8x16xbf16>
    "tpu.trace_start"() <{level = 10 : i32, message = "bqd,bkd->bqk"}> : () -> ()
    %cst_28 = arith.constant dense<0.000000e+00> : vector<2x8x8xf32>
    %79 = tpu.matmul %74, %76, %cst_28 {dimension_numbers = #tpu.dot_dimension_numbers<[2], [2], [1], [1], [0, 0, 0, 1, 1, 1], [0], [0]>} : vector<2x8x16xbf16>, vector<2x8x16xbf16>, vector<2x8x8xf32> -> vector<2x8x8xf32>
    "tpu.trace_stop"() : () -> ()
    %cst_29 = arith.constant 2.500000e-01 : f32
    %80 = vector.broadcast %cst_29 : f32 to vector<2x8x8xf32>
    %81 = arith.mulf %79, %80 : vector<2x8x8xf32>
    %cst_30 = arith.constant -1.000000e+30 : f32
    %82 = vector.broadcast %cst_30 : f32 to vector<2x8x8xf32>
    %83 = arith.select %48, %81, %82 : vector<2x8x8xi1>, vector<2x8x8xf32>
    %cst_31 = arith.constant dense<0xFF800000> : vector<2x8xf32>
    %84 = vector.multi_reduction <maximumf>, %83, %cst_31 [2] : vector<2x8x8xf32> to vector<2x8xf32>
    %85 = vector.shape_cast %84 : vector<2x8xf32> to vector<2x8x1xf32>
    %86 = vector.broadcast %85 : vector<2x8x1xf32> to vector<2x8x8xf32>
    %87 = arith.subf %83, %86 : vector<2x8x8xf32>
    %88 = math.exp %87 : vector<2x8x8xf32>
    %cst_32 = arith.constant dense<0.000000e+00> : vector<2x8xf32>
    %89 = vector.multi_reduction <add>, %88, %cst_32 [2] : vector<2x8x8xf32> to vector<2x8xf32>
    %90 = vector.shape_cast %89 : vector<2x8xf32> to vector<2x8x1xf32>
    %91 = tpu.reciprocal %90 : vector<2x8x1xf32> -> vector<2x8x1xf32>
    %92 = vector.broadcast %91 : vector<2x8x1xf32> to vector<2x8x8xf32>
    %93 = arith.mulf %88, %92 : vector<2x8x8xf32>
    %94 = arith.truncf %93 : vector<2x8x8xf32> to vector<2x8x8xbf16>
    "tpu.trace_start"() <{level = 10 : i32, message = "bqk,bkd->bqd"}> : () -> ()
    %cst_33 = arith.constant dense<0.000000e+00> : vector<2x8x16xf32>
    %95 = tpu.matmul %94, %78, %cst_33 {dimension_numbers = #tpu.dot_dimension_numbers<[2], [1], [1], [2], [0, 0, 0, 1, 1, 2], [0], [0]>} : vector<2x8x8xbf16>, vector<2x8x16xbf16>, vector<2x8x16xf32> -> vector<2x8x16xf32>
    "tpu.trace_stop"() : () -> ()
    %c0_34 = arith.constant 0 : index
    %c0_35 = arith.constant 0 : index
    %c16 = arith.constant 16 : index
    %96 = vector.load %arg15[%c0_34, %c0_35, %c16] : memref<2x8x32xf32, #tpu.memory_space<vmem>>, vector<2x8x16xf32>
    tpu.vector_store %arg15[%c0_34, %c0_35, %c16], %95 {strides = array<i32>} : memref<2x8x32xf32, #tpu.memory_space<vmem>>, vector<2x8x16xf32>,
    %c0_36 = arith.constant 0 : index
    %c0_37 = arith.constant 0 : index
    %c0_38 = arith.constant 0 : index
    %97 = vector.load %arg15[%c0_36, %c0_37, %c0_38] : memref<2x8x32xf32, #tpu.memory_space<vmem>>, vector<2x8x32xf32>
    %98 = vector.shape_cast %97 : vector<2x8x32xf32> to vector<16x32xf32>
    %99 = arith.truncf %98 : vector<16x32xf32> to vector<16x32xbf16>
    %c0_39 = arith.constant 0 : index
    %c0_40 = arith.constant 0 : index
    %c0_41 = arith.constant 0 : index
    %100 = vector.load %arg6[%c0_39, %c0_40, %c0_41] : memref<1x32x32xbf16, #tpu.memory_space<vmem>>, vector<1x32x32xbf16>
    %101 = vector.shape_cast %100 : vector<1x32x32xbf16> to vector<32x32xbf16>
    %cst_42 = arith.constant dense<0.000000e+00> : vector<16x32xf32>
    %102 = tpu.matmul %99, %101, %cst_42 {dimension_numbers = #tpu.dot_dimension_numbers<[1], [0], [0], [1], [0, 0, 1, 1], [], []>} : vector<16x32xbf16>, vector<32x32xbf16>, vector<16x32xf32> -> vector<16x32xf32>
    %c0_43 = arith.constant 0 : index
    %c0_44 = arith.constant 0 : index
    %c0_45 = arith.constant 0 : index
    %103 = vector.load %arg7[%c0_43, %c0_44, %c0_45] : memref<1x1x32xf32, #tpu.memory_space<vmem>>, vector<1x1x32xf32>
    %104 = vector.shape_cast %103 : vector<1x1x32xf32> to vector<1x32xf32>
    %105 = vector.broadcast %104 : vector<1x32xf32> to vector<16x32xf32>
    %106 = arith.addf %102, %105 : vector<16x32xf32>
    %107 = arith.addf %3, %106 : vector<16x32xf32>
    %c0_46 = arith.constant 0 : index
    %c0_47 = arith.constant 0 : index
    %c0_48 = arith.constant 0 : index
    %108 = vector.load %arg8[%c0_46, %c0_47, %c0_48] : memref<1x1x32xf32, #tpu.memory_space<vmem>>, vector<1x1x32xf32>
    %109 = vector.shape_cast %108 : vector<1x1x32xf32> to vector<1x32xf32>
    %c0_49 = arith.constant 0 : index
    %c0_50 = arith.constant 0 : index
    %c0_51 = arith.constant 0 : index
    %110 = vector.load %arg9[%c0_49, %c0_50, %c0_51] : memref<1x1x32xf32, #tpu.memory_space<vmem>>, vector<1x1x32xf32>
    %111 = vector.shape_cast %110 : vector<1x1x32xf32> to vector<1x32xf32>
    %cst_52 = arith.constant dense<0.000000e+00> : vector<16xf32>
    %112 = vector.multi_reduction <add>, %107, %cst_52 [1] : vector<16x32xf32> to vector<16xf32>
    %113 = vector.shape_cast %112 : vector<16xf32> to vector<16x1xf32>
    %cst_53 = arith.constant 3.200000e+01 : f32
    %114 = vector.broadcast %cst_53 : f32 to vector<16x1xf32>
    %115 = arith.divf %113, %114 : vector<16x1xf32>
    %116 = vector.broadcast %115 : vector<16x1xf32> to vector<16x32xf32>
    %117 = arith.subf %107, %116 : vector<16x32xf32>
    %118 = vector.broadcast %115 : vector<16x1xf32> to vector<16x32xf32>
    %119 = arith.subf %107, %118 : vector<16x32xf32>
    %120 = arith.mulf %117, %119 : vector<16x32xf32>
    %cst_54 = arith.constant dense<0.000000e+00> : vector<16xf32>
    %121 = vector.multi_reduction <add>, %120, %cst_54 [1] : vector<16x32xf32> to vector<16xf32>
    %122 = vector.shape_cast %121 : vector<16xf32> to vector<16x1xf32>
    %cst_55 = arith.constant 3.200000e+01 : f32
    %123 = vector.broadcast %cst_55 : f32 to vector<16x1xf32>
    %124 = arith.divf %122, %123 : vector<16x1xf32>
    %125 = vector.broadcast %115 : vector<16x1xf32> to vector<16x32xf32>
    %126 = arith.subf %107, %125 : vector<16x32xf32>
    %cst_56 = arith.constant 9.99999974E-6 : f32
    %127 = vector.broadcast %cst_56 : f32 to vector<16x1xf32>
    %128 = arith.addf %124, %127 : vector<16x1xf32>
    %129 = math.rsqrt %128 : vector<16x1xf32>
    %130 = vector.broadcast %129 : vector<16x1xf32> to vector<16x32xf32>
    %131 = arith.mulf %126, %130 : vector<16x32xf32>
    %132 = vector.broadcast %109 : vector<1x32xf32> to vector<16x32xf32>
    %133 = arith.mulf %131, %132 : vector<16x32xf32>
    %134 = vector.broadcast %111 : vector<1x32xf32> to vector<16x32xf32>
    %135 = arith.addf %133, %134 : vector<16x32xf32>
    %136 = arith.truncf %135 : vector<16x32xf32> to vector<16x32xbf16>
    %c0_57 = arith.constant 0 : index
    %c0_58 = arith.constant 0 : index
    %c0_59 = arith.constant 0 : index
    %137 = vector.load %arg10[%c0_57, %c0_58, %c0_59] : memref<1x32x128xbf16, #tpu.memory_space<vmem>>, vector<1x32x128xbf16>
    %138 = vector.shape_cast %137 : vector<1x32x128xbf16> to vector<32x128xbf16>
    %cst_60 = arith.constant dense<0.000000e+00> : vector<16x128xf32>
    %139 = tpu.matmul %136, %138, %cst_60 {dimension_numbers = #tpu.dot_dimension_numbers<[1], [0], [0], [1], [0, 0, 1, 1], [], []>} : vector<16x32xbf16>, vector<32x128xbf16>, vector<16x128xf32> -> vector<16x128xf32>
    %c0_61 = arith.constant 0 : index
    %c0_62 = arith.constant 0 : index
    %c0_63 = arith.constant 0 : index
    %140 = vector.load %arg11[%c0_61, %c0_62, %c0_63] : memref<1x1x128xf32, #tpu.memory_space<vmem>>, vector<1x1x128xf32>
    %141 = vector.shape_cast %140 : vector<1x1x128xf32> to vector<1x128xf32>
    %142 = vector.broadcast %141 : vector<1x128xf32> to vector<16x128xf32>
    %143 = arith.addf %139, %142 : vector<16x128xf32>
    %cst_64 = arith.constant 5.000000e-01 : f32
    %144 = vector.broadcast %cst_64 : f32 to vector<16x128xf32>
    %145 = arith.mulf %144, %143 : vector<16x128xf32>
    %cst_65 = arith.constant 4.471500e-02 : f32
    %146 = vector.broadcast %cst_65 : f32 to vector<16x128xf32>
    %147 = arith.mulf %146, %143 : vector<16x128xf32>
    %148 = arith.mulf %147, %143 : vector<16x128xf32>
    %149 = arith.mulf %148, %143 : vector<16x128xf32>
    %150 = arith.addf %143, %149 : vector<16x128xf32>
    %cst_66 = arith.constant 0.797884583 : f32
    %151 = vector.broadcast %cst_66 : f32 to vector<16x128xf32>
    %152 = arith.mulf %151, %150 : vector<16x128xf32>
    %153 = math.tanh %152 : vector<16x128xf32>
    %cst_67 = arith.constant 1.000000e+00 : f32
    %154 = vector.broadcast %cst_67 : f32 to vector<16x128xf32>
    %155 = arith.addf %154, %153 : vector<16x128xf32>
    %156 = arith.mulf %145, %155 : vector<16x128xf32>
    %157 = arith.truncf %156 : vector<16x128xf32> to vector<16x128xbf16>
    %c0_68 = arith.constant 0 : index
    %c0_69 = arith.constant 0 : index
    %c0_70 = arith.constant 0 : index
    %158 = vector.load %arg12[%c0_68, %c0_69, %c0_70] : memref<1x128x32xbf16, #tpu.memory_space<vmem>>, vector<1x128x32xbf16>
    %159 = vector.shape_cast %158 : vector<1x128x32xbf16> to vector<128x32xbf16>
    %cst_71 = arith.constant dense<0.000000e+00> : vector<16x32xf32>
    %160 = tpu.matmul %157, %159, %cst_71 {dimension_numbers = #tpu.dot_dimension_numbers<[1], [0], [0], [1], [0, 0, 1, 1], [], []>} : vector<16x128xbf16>, vector<128x32xbf16>, vector<16x32xf32> -> vector<16x32xf32>
    %c0_72 = arith.constant 0 : index
    %c0_73 = arith.constant 0 : index
    %c0_74 = arith.constant 0 : index
    %161 = vector.load %arg13[%c0_72, %c0_73, %c0_74] : memref<1x1x32xf32, #tpu.memory_space<vmem>>, vector<1x1x32xf32>
    %162 = vector.shape_cast %161 : vector<1x1x32xf32> to vector<1x32xf32>
    %163 = vector.broadcast %162 : vector<1x32xf32> to vector<16x32xf32>
    %164 = arith.addf %160, %163 : vector<16x32xf32>
    %165 = arith.addf %107, %164 : vector<16x32xf32>
    %c0_75 = arith.constant 0 : index
    %c0_76 = arith.constant 0 : index
    %166 = vector.load %arg14[%c0_75, %c0_76] : memref<16x32xf32, #tpu.memory_space<vmem>>, vector<16x32xf32>
    tpu.vector_store %arg14[%c0_75, %c0_76], %165 {strides = array<i32>} : memref<16x32xf32, #tpu.memory_space<vmem>>, vector<16x32xf32>,
    return
  }
  func.func @transform_0(%arg0: i32) -> (i32, i32) {
    %c0_i32 = arith.constant 0 : i32
    %c0_i32_0 = arith.constant 0 : i32
    %c0_i32_1 = arith.constant 0 : i32
    return %c0_i32, %c0_i32_0 : i32, i32
  }
  func.func @transform_1(%arg0: i32) -> (i32, i32, i32) {
    %c0_i32 = arith.constant 0 : i32
    %c0_i32_0 = arith.constant 0 : i32
    %c0_i32_1 = arith.constant 0 : i32
    return %arg0, %c0_i32, %c0_i32_0 : i32, i32, i32
  }
  func.func @transform_2(%arg0: i32) -> (i32, i32, i32) {
    %c0_i32 = arith.constant 0 : i32
    %c0_i32_0 = arith.constant 0 : i32
    %c0_i32_1 = arith.constant 0 : i32
    return %arg0, %c0_i32, %c0_i32_0 : i32, i32, i32
  }
  func.func @transform_3(%arg0: i32) -> (i32, i32, i32) {
    %c0_i32 = arith.constant 0 : i32
    %c0_i32_0 = arith.constant 0 : i32
    %c0_i32_1 = arith.constant 0 : i32
    return %arg0, %c0_i32, %c0_i32_0 : i32, i32, i32
  }
  func.func @transform_4(%arg0: i32) -> (i32, i32, i32) {
    %c0_i32 = arith.constant 0 : i32
    %c0_i32_0 = arith.constant 0 : i32
    %c0_i32_1 = arith.constant 0 : i32
    return %arg0, %c0_i32, %c0_i32_0 : i32, i32, i32
  }
  func.func @transform_5(%arg0: i32) -> (i32, i32, i32) {
    %c0_i32 = arith.constant 0 : i32
    %c0_i32_0 = arith.constant 0 : i32
    %c0_i32_1 = arith.constant 0 : i32
    return %arg0, %c0_i32, %c0_i32_0 : i32, i32, i32
  }
  func.func @transform_6(%arg0: i32) -> (i32, i32, i32) {
    %c0_i32 = arith.constant 0 : i32
    %c0_i32_0 = arith.constant 0 : i32
    %c0_i32_1 = arith.constant 0 : i32
    return %arg0, %c0_i32, %c0_i32_0 : i32, i32, i32
  }
  func.func @transform_7(%arg0: i32) -> (i32, i32, i32) {
    %c0_i32 = arith.constant 0 : i32
    %c0_i32_0 = arith.constant 0 : i32
    %c0_i32_1 = arith.constant 0 : i32
    return %arg0, %c0_i32, %c0_i32_0 : i32, i32, i32
  }
  func.func @transform_8(%arg0: i32) -> (i32, i32, i32) {
    %c0_i32 = arith.constant 0 : i32
    %c0_i32_0 = arith.constant 0 : i32
    %c0_i32_1 = arith.constant 0 : i32
    return %arg0, %c0_i32, %c0_i32_0 : i32, i32, i32
  }
  func.func @transform_9(%arg0: i32) -> (i32, i32, i32) {
    %c0_i32 = arith.constant 0 : i32
    %c0_i32_0 = arith.constant 0 : i32
    %c0_i32_1 = arith.constant 0 : i32
    return %arg0, %c0_i32, %c0_i32_0 : i32, i32, i32
  }
  func.func @transform_10(%arg0: i32) -> (i32, i32, i32) {
    %c0_i32 = arith.constant 0 : i32
    %c0_i32_0 = arith.constant 0 : i32
    %c0_i32_1 = arith.constant 0 : i32
    return %arg0, %c0_i32, %c0_i32_0 : i32, i32, i32
  }
  func.func @transform_11(%arg0: i32) -> (i32, i32, i32) {
    %c0_i32 = arith.constant 0 : i32
    %c0_i32_0 = arith.constant 0 : i32
    %c0_i32_1 = arith.constant 0 : i32
    return %arg0, %c0_i32, %c0_i32_0 : i32, i32, i32
  }
  func.func @transform_12(%arg0: i32) -> (i32, i32, i32) {
    %c0_i32 = arith.constant 0 : i32
    %c0_i32_0 = arith.constant 0 : i32
    %c0_i32_1 = arith.constant 0 : i32
    return %arg0, %c0_i32, %c0_i32_0 : i32, i32, i32
  }
  func.func @transform_13(%arg0: i32) -> (i32, i32) {
    %c0_i32 = arith.constant 0 : i32
    %c0_i32_0 = arith.constant 0 : i32
    %c0_i32_1 = arith.constant 0 : i32
    return %c0_i32, %c0_i32_0 : i32, i32
  }
}

</mosaic_0001>

<bundles_post_ra>
// kernel: trip_dial_gpt2_forward.3
= control target key start
LH: loop header
LB: loop body
LE: loop exit
PB: predicated region body
PF: predicated region fallthrough
CT: control target
= control target key end

     0   :  { %vm29_vm0 = vcmask 261120   ;;  %s604_s0 = inlined_call_operand.vmem [shape: f32[16,32], index: 0, kind: input, shape index: {}]   ;;  %s605_s1 = inlined_call_operand.vmem [shape: f32[1,32], index: 1, kind: input, shape index: {}]   ;;  %s606_s2 = inlined_call_operand.vmem [shape: f32[1,32], index: 2, kind: input, shape index: {}]   ;;  %s607_s3 = inlined_call_operand.vmem [shape: bf16[128,32], index: 3, kind: input, shape index: {}]   ;;  %s608_s4 = inlined_call_operand.vmem [shape: s32[16,1], index: 4, kind: input, shape index: {}]   ;;  %s609_s5 = inlined_call_operand.vmem [shape: f32[16,1], index: 5, kind: input, shape index: {}]   ;;  %s610_s6 = inlined_call_operand.vmem [shape: f32[4], index: 6, kind: output, shape index: {}]  }
   0x1   :  { %v25_v0 = vld [vmem:[%s604_s0] sm:$0xff]  ;;  %v26_v1 = vld [vmem:[%s604_s0 + $0x8] sm:$0xff] }
   0x2   :  { %v30_v2 = vsel %vm29_vm0, %v25_v0, 0.0  ;;  %v33_v3 = vsel %vm29_vm0, %v26_v1, 0.0 }
   0x3   :  { %31 = vadd.xlane.f32.xlu0 %v30_v2 }
   0x7   :  { %34 = vadd.xlane.f32.xlu0 %v33_v3 }
   0x8   :  { %11 = vsyncpa [#allocation3], 0  ;;  %v424_v4 = vld [vmem:[%s607_s3 + $0x38] sm:$0xff]   ;;  %v458_v5 = vmov 0.0   ;;  %v425_v7 = vld [vmem:[%s607_s3 + $0x30] sm:$0xff]   ;;  %vm459_vm1 = vmmov 0   ;;  %v222_v53 = vlaneseq }
   0x9   :  { %390 = vmatprep.subr.bf16.mxu0 %v458_v5  ;;  %v155_v6 = vsel %vm29_vm0, %v424_v4, 0  ;;  %v152_v8 = vsel %vm29_vm0, %v425_v7, 0  ;;  %v426_v9 = vld [vmem:[%s607_s3 + $0x28] sm:$0xff]   ;;  %v427_v11 = vld [vmem:[%s607_s3 + $0x20] sm:$0xff]   ;;  %v428_v13 = vld [vmem:[%s607_s3 + $0x18] sm:$0xff]   ;;  %406 = vmatprep.mubr.msk.bf16.mxu0 %vm459_vm1, %v458_v5  ;;  %v460_v52 = vmov 0  }
   0xa   :  { %391 = vmatpush3.bf16.xpose.msra.mxu0 %v155_v6  ;;  %v149_v10 = vsel %vm29_vm0, %v426_v9, 0  ;;  %v146_v12 = vsel %vm29_vm0, %v427_v11, 0  ;;  %v143_v14 = vsel %vm29_vm0, %v428_v13, 0  ;;  %v429_v25 = vld [vmem:[%s607_s3 + $0x10] sm:$0xff]   ;;  %v430_v27 = vld [vmem:[%s607_s3 + $0x8] sm:$0xff]   ;;  %v431_v29 = vld [vmem:[%s607_s3] sm:$0xff]   ;;  %423 = vset.pattern.permute.xlu1 %v460_v52 }
   0xb   :  { %392 = vmatprep.subr.bf16.mxu0 %v458_v5  ;;  %v140_v26 = vsel %vm29_vm0, %v429_v25, 0  ;;  %v137_v28 = vsel %vm29_vm0, %v430_v27, 0  ;;  %v134_v30 = vsel %vm29_vm0, %v431_v29, 0  ;;  %v364_v39 = vld [vmem:[%s605_s1] ss:$0 sm:$0xff]  ;;  %422 = vset.pattern.permute.xlu0 %v460_v52  ;;  %v223_v54 = vand.u32 127, %v222_v53 }
   0xc   :  { %v365_v43 = vld [vmem:[%s606_s2] ss:$0 sm:$0xff]  ;;  %v564_v63 = vld [vmem:[%s608_s4 + $0x8] sm:$0xff]  ;;  %vm284_vm10 = vcmask 7168   ;;  %s355_s25 = sshll.u32 %s610_s6, 4  ;;  %s356_s25 = int_to_ptr.vmem [resolvable:$true] %s355_s25 }
   0xd   :  { %vm243_vm8 = vcmp.ne.s32.totalorder %v564_v63, 4294967196  ;;  %s444_s29 = scalar_lea.vmem %s356_s25, 16  ;;  %p449_p1 = scmp.lt.s32.totalorder %s356_s25, %s356_s25 }
   0xe   :  { %p445_p0 = scmp.ne.s32.totalorder %s356_s25, %s444_s29  ;;  %p450_p2 = scmp.lt.s32.totalorder %s444_s29, %s444_s29 }
  0x10   :  { %p451_p3 = por %p450_p2, %p449_p1 }
  0x12   :  { %393 = vmatpush3.bf16.xpose.msra.mxu0 %v152_v8  ;;  %p452_p4 = pnand %p451_p3, %p445_p0 }
  0x13   :  { %394 = vmatprep.subr.bf16.mxu0 %v458_v5 }
  0x1a   :  { %395 = vmatpush3.bf16.xpose.msra.mxu0 %v149_v10 }
  0x1b   :  { %396 = vmatprep.subr.bf16.mxu0 %v458_v5 }
  0x22   :  { %397 = vmatpush3.bf16.xpose.msra.mxu0 %v146_v12 }
  0x23   :  { %398 = vmatprep.subr.bf16.mxu0 %v458_v5 }
  0x2a   :  { %399 = vmatpush3.bf16.xpose.msra.mxu0 %v143_v14 }
  0x2b   :  { %400 = vmatprep.subr.bf16.mxu0 %v458_v5 }
  0x32   :  { %401 = vmatpush3.bf16.xpose.msra.mxu0 %v140_v26 }
  0x33   :  { %402 = vmatprep.subr.bf16.mxu0 %v458_v5 }
  0x3a   :  { %403 = vmatpush3.bf16.xpose.msra.mxu0 %v137_v28 }
  0x3b   :  { %404 = vmatprep.subr.bf16.mxu0 %v458_v5 }
  0x42   :  { %405 = vmatpush3.bf16.xpose.msra.mxu0 %v134_v30 }
  0x8c   :  { %v32_v15 = vpop.xlane.xlu0 %31 }
  0x8d   :  { %v37_v16 = vmul.f32 0.03125, %v32_v15 }
  0x8f   :  { %v39_v17 = vsub.f32 %v25_v0, %v37_v16  ;;  %v569_v0 = vld [vmem:[%s608_s4] sm:$0xff] }
  0x90   :  { %v35_v18 = vpop.xlane.xlu0 %34  ;;  %vm242_vm9 = vcmp.ne.s32.totalorder %v569_v0, 4294967196 }
  0x91   :  { %v38_v19 = vmul.f32 0.03125, %v35_v18  ;;  %v41_v20 = vmul.f32 %v39_v17, %v39_v17 }
  0x93   :  { %v40_v21 = vsub.f32 %v26_v1, %v38_v19  ;;  %v43_v22 = vsel %vm29_vm0, %v41_v20, 0.0 }
  0x94   :  { %44 = vadd.xlane.f32.xlu1 %v43_v22  ;;  %v377_v22 = vsel %vm242_vm9, 1.0, %v458_v5 }
  0x95   :  { %v42_v23 = vmul.f32 %v40_v21, %v40_v21 }
  0x97   :  { %v46_v24 = vsel %vm29_vm0, %v42_v23, 0.0  ;;  %v378_v23 = vsel %vm243_vm8, 1.0, %v458_v5 }
  0x98   :  { %47 = vadd.xlane.f32.xlu1 %v46_v24  ;;  %v299_v24 = vsel %vm284_vm10, %v377_v22, 0.0  ;;  %v300_v25 = vsel %vm284_vm10, %v378_v23, 0.0 }
  0x99   :  { %v301_v26 = vadd.f32 %v300_v25, %v299_v24 }
 0x11d   :  { %v45_v31 = vpop.xlane.xlu1 %44 }
 0x11e   :  { %v49_v32 = vmul.f32 0.03125, %v45_v31 }
 0x120   :  { %v51_v33 = vadd.f32 1e-05, %v49_v32 }
 0x121   :  { %v48_v34 = vpop.xlane.xlu1 %47 }
 0x122   :  { %432 = vrsqrt.f32 %v51_v33  ;;  %v50_v35 = vmul.f32 0.03125, %v48_v34 }
 0x124   :  { %v52_v36 = vadd.f32 1e-05, %v50_v35 }
 0x126   :  { %434 = vrsqrt.f32 %v52_v36 }
 0x12f   :  { %v433_v37 = vpop.eup %432 }
 0x130   :  { %v55_v38 = vmul.f32 %v433_v37, %v39_v17 }
 0x132   :  { %v63_v42 = vmul.f32 %v364_v39, %v55_v38 }
 0x133   :  { %v435_v40 = vpop.eup %434 }
 0x134   :  { %v56_v41 = vmul.f32 %v435_v40, %v40_v21  ;;  %v71_v45 = vadd.f32 %v365_v43, %v63_v42 }
 0x136   :  { %v64_v44 = vmul.f32 %v364_v39, %v56_v41 }
 0x138   :  { %v72_v46 = vadd.f32 %v365_v43, %v64_v44 }
 0x13a   :  { %v73_v47 = vpack.c.bf16 %v72_v46, %v71_v45  ;;  %v200_v45 = vld [vmem:[%s609_s5] sm:$0xff] }
 0x13c   :  { %407 = vmatmul.mubr.msk.bf16.vlgmr.msra.gmra.mxu0 %vm29_vm0, %v73_v47 }
 0x1fc   :  { %v191_v48 = vpop.f32.mrf.mxu0 }
 0x1fd   :  { %202 = vmax.xlane.f32.xlu0 %v191_v48 }
 0x1fe   :  { %v408_v49 = vpop.f32.mrf.mxu0 }
 0x200   :  { %v194_v50 = vpop.f32.mrf.mxu0 }
 0x201   :  { %204 = vmax.xlane.f32.xlu1 %v194_v50 }
 0x202   :  { %v409_v51 = vpop.f32.mrf.mxu0 }
 0x286   :  { %v555_v55 = vpop.xlane.xlu0 %202 }
 0x287   :  { %vm248_vm2 = vcmp.eq.f32.partialorder %v191_v48, %v555_v55  ;;  %v206_v2 = vsub.f32 %v191_v48, %v555_v55 }
 0x288   :  { %v250_v56 = vsel %vm248_vm2, %v223_v54, 128 }
 0x289   :  { %v253_v57 = vshra.s32 %v250_v56, 16  ;;  %v208_v4 = vmul.f32 1.442695, %v206_v2  ;;  %v252_v12 = vand.u32 65535, %v250_v56 }
 0x28a   :  { %v558_v58 = vpop.xlane.xlu1 %204 }
 0x28b   :  { %vm249_vm3 = vcmp.eq.f32.partialorder %v194_v50, %v558_v58  ;;  %v255_v59 = vcvt.s32.f32 %v253_v57  ;;  %v207_v1 = vsub.f32 %v194_v50, %v558_v58  ;;  %v254_v15 = vcvt.s32.f32 %v252_v12 }
 0x28c   :  { %v251_v60 = vsel %vm249_vm3, %v223_v54, 128  ;;  %v335_v57 = vsel %vm284_vm10, %v200_v45, 0.0 }
 0x28d   :  { %256 = vmin.xlane.f32.xlu0 %v255_v59  ;;  %v267_v61 = vshra.s32 %v251_v60, 16  ;;  %v210_v3 = vmul.f32 1.442695, %v207_v1  ;;  %v266_v16 = vand.u32 65535, %v251_v60 }
 0x28f   :  { %v269_v62 = vcvt.s32.f32 %v267_v61  ;;  %436 = vpow2.f32 %v210_v3  ;;  %v268_v18 = vcvt.s32.f32 %v266_v16 }
 0x290   :  { %438 = vpow2.f32 %v208_v4 }
 0x291   :  { %270 = vmin.xlane.f32.xlu1 %v269_v62 }
 0x29c   :  { %v437_v6 = vpop.eup %436 }
 0x29d   :  { %v439_v7 = vpop.eup %438 }
 0x2a2   :  { %228 = vperm.xlu1 %423, %v564_v63  }
 0x2a3   :  { %225 = vperm.xlu0 %422, %v569_v0  }
 0x2c2   :  { %214 = vadd.xlane.f32.xlu0 %v437_v6 }
 0x2c6   :  { %212 = vadd.xlane.f32.xlu1 %v439_v7 }
 0x316   :  { %v257_v8 = vpop.xlane.xlu0 %256 }
 0x317   :  { %vm258_vm5 = vcmp.eq.f32.partialorder %v255_v59, %v257_v8  ;;  %v263_v31 = vcvt.f32.s32 %v257_v8 }
 0x318   :  { %v259_v17 = vsel %vm258_vm5, %v254_v15, inf }
 0x319   :  { %v264_v35 = vshll.u32 %v263_v31, 16 }
 0x31a   :  { %v271_v9 = vpop.xlane.xlu1 %270 }
 0x31b   :  { %vm272_vm7 = vcmp.eq.f32.partialorder %v269_v62, %v271_v9  ;;  %v277_v36 = vcvt.f32.s32 %v271_v9 }
 0x31c   :  { %v273_v20 = vsel %vm272_vm7, %v268_v18, inf }
 0x31d   :  { %v278_v42 = vshll.u32 %v277_v36, 16 }
 0x31e   :  { %v226_v10 = vpop.permute.xlu0 %225  ;;  %v229_v14 = vpop.permute.xlu1 %228 }
 0x31f   :  { %vm230_vm4 = vcmp.eq.s32.totalorder %v223_v54, %v226_v10  ;;  %vm231_vm6 = vcmp.eq.s32.totalorder %v223_v54, %v229_v14 }
 0x320   :  { %v375_v11 = vsel %vm230_vm4, 1.0, %v458_v5  ;;  %v376_v19 = vsel %vm231_vm6, 1.0, %v458_v5 }
 0x321   :  { %v236_v13 = vmul.f32 %v375_v11, %v191_v48  ;;  %v237_v21 = vmul.f32 %v376_v19, %v194_v50  ;;  %v201_v50 = vld [vmem:[%s609_s5 + $0x8] sm:$0xff] }
 0x322   :  { %v336_v59 = vsel %vm284_vm10, %v201_v50, 0.0 }
 0x323   :  { %238 = vadd.xlane.f32.xlu1 %v236_v13  ;;  %v337_v1 = vadd.f32 %v336_v59, %v335_v57 }
 0x327   :  { %260 = vmin.xlane.f32.xlu1 %v259_v17 }
 0x32b   :  { %274 = vmin.xlane.f32.xlu1 %v273_v20 }
 0x32f   :  { %240 = vadd.xlane.f32.xlu1 %v237_v21 }
 0x333   :  { %302 = vadd.xlane.f32.xlu1 %v301_v26 }
 0x34b   :  { %v215_v28 = vpop.xlane.xlu0 %214 }
 0x34f   :  { %v213_v27 = vpop.xlane.xlu1 %212 }
 0x350   :  { %440 = vlog2.f32 %v213_v27 }
 0x351   :  { %442 = vlog2.f32 %v215_v28 }
 0x35d   :  { %v441_v29 = vpop.eup %440 }
 0x35e   :  { %v217_v32 = vmul.f32 0.6931472, %v441_v29  ;;  %v443_v33 = vpop.eup %442 }
 0x35f   :  { %v219_v38 = vmul.f32 0.6931472, %v443_v33 }
 0x360   :  { %v220_v39 = vadd.f32 %v217_v32, %v555_v55 }
 0x361   :  { %v221_v48 = vadd.f32 %v219_v38, %v558_v58 }
 0x3ac   :  { %v239_v30 = vpop.xlane.xlu1 %238 }
 0x3ad   :  { %v280_v43 = vsub.f32 %v220_v39, %v239_v30 }
 0x3af   :  { %v282_v51 = vmul.f32 %v377_v22, %v280_v43 }
 0x3b0   :  { %v261_v34 = vpop.xlane.xlu1 %260 }
 0x3b1   :  { %v262_v37 = vcvt.f32.s32 %v261_v34  ;;  %v285_v61 = vsel %vm284_vm10, %v282_v51, 0.0 }
 0x3b3   :  { %v265_v40 = vadd.s32 %v264_v35, %v262_v37 }
 0x3b4   :  { %v275_v41 = vpop.xlane.xlu1 %274 }
 0x3b5   :  { %vm313_vm11 = vcmp.eq.s32.totalorder %v265_v40, %v569_v0  ;;  %v276_v44 = vcvt.f32.s32 %v275_v41 }
 0x3b6   :  { %v379_v46 = vsel %vm313_vm11, 1.0, %v458_v5 }
 0x3b7   :  { %v279_v47 = vadd.s32 %v278_v42, %v276_v44  ;;  %v319_v53 = vmul.f32 %v379_v46, %v200_v45 }
 0x3b8   :  { %v241_v49 = vpop.xlane.xlu1 %240 }
 0x3b9   :  { %vm314_vm12 = vcmp.eq.s32.totalorder %v279_v47, %v564_v63  ;;  %v281_v52 = vsub.f32 %v221_v48, %v241_v49  ;;  %v321_v58 = vsel %vm284_vm10, %v319_v53, 0.0 }
 0x3ba   :  { %v380_v54 = vsel %vm314_vm12, 1.0, %v458_v5 }
 0x3bb   :  { %v283_v55 = vmul.f32 %v378_v23, %v281_v52  ;;  %v320_v56 = vmul.f32 %v380_v54, %v201_v50 }
 0x3bc   :  { %v303_v5 = vpop.xlane.xlu1 %302 }
 0x3bd   :  { %v322_v60 = vsel %vm284_vm10, %v320_v56, 0.0  ;;  %v286_v62 = vsel %vm284_vm10, %v283_v55, 0.0  ;;  %v304_v2 = vrot.slane %v303_v5, 4 }
 0x3be   :  { %v323_v0 = vadd.f32 %v322_v60, %v321_v58  ;;  %v287_v63 = vadd.f32 %v286_v62, %v285_v61 }
 0x3bf   :  { %v305_v3 = vadd.f32 %v304_v2, %v303_v5 }
 0x3c0   :  { %324 = vadd.xlane.f32.xlu0 %v323_v0  ;;  %288 = vadd.xlane.f32.xlu1 %v287_v63 }
 0x3c1   :  { %v306_v4 = vrot.slane %v305_v3, 2 }
 0x3c3   :  { %v307_v13 = vadd.f32 %v306_v4, %v305_v3 }
 0x3c4   :  { %338 = vadd.xlane.f32.xlu1 %v337_v1 }
 0x3c5   :  { %v308_v20 = vrot.slane %v307_v13, 1 }
 0x3c7   :  { %v309_v27 = vadd.f32 %v308_v20, %v307_v13 }
 0x449   :  { %v289_v6 = vpop.xlane.xlu1 %288  ;;  %v325_v7 = vpop.xlane.xlu0 %324 }
 0x44a   :  { %v290_v8 = vrot.slane %v289_v6, 4  ;;  %v326_v9 = vrot.slane %v325_v7, 4 }
 0x44c   :  { %v291_v10 = vadd.f32 %v290_v8, %v289_v6  ;;  %v327_v11 = vadd.f32 %v326_v9, %v325_v7 }
 0x44d   :  { %v339_v12 = vpop.xlane.xlu1 %338 }
 0x44e   :  { %v292_v14 = vrot.slane %v291_v10, 2  ;;  %v328_v15 = vrot.slane %v327_v11, 2  ;;  %v340_v16 = vrot.slane %v339_v12, 4 }
 0x450   :  { %v329_v17 = vadd.f32 %v328_v15, %v327_v11  ;;  %v341_v18 = vadd.f32 %v340_v16, %v339_v12  ;;  %v293_v19 = vadd.f32 %v292_v14, %v291_v10 }
 0x452   :  { %v342_v21 = vrot.slane %v341_v18, 2  ;;  %v294_v22 = vrot.slane %v293_v19, 1  ;;  %v330_v23 = vrot.slane %v329_v17, 1 }
 0x454   :  { %v343_v24 = vadd.f32 %v342_v21, %v341_v18  ;;  %v295_v25 = vadd.f32 %v294_v22, %v293_v19  ;;  %v331_v26 = vadd.f32 %v330_v23, %v329_v17 }
 0x456   :  { %410 = vpush %v295_v25  ;;  %v344_v28 = vrot.slane %v343_v24, 1 }
 0x457   :  { %412 = vpush %v309_v27 }
 0x458   :  { %414 = vpush %v331_v26  ;;  %v345_v29 = vadd.f32 %v344_v28, %v343_v24 }
 0x45a   :  { %416 = vpush %v345_v29 }
 0x487   :  { %s411_s26 = spop %410 }
 0x488   :  { %298 = sst [smem:[#allocation2]] %s411_s26  ;;  %s413_s0 = spop %412 }
 0x489   :  { %312 = sst [smem:[#allocation2 + $0x1]] %s413_s0  ;;  %s415_s27 = spop %414 }
 0x48a   :  { %334 = sst [smem:[#allocation2 + $0x2]] %s415_s27 }
 0x48b   :  { %s417_s28 = spop %416 }
 0x48c   :  { %348 = sst [smem:[#allocation2 + $0x3]] %s417_s28 }
 0x48d   :  { %455 = shalt.err (!%p452_p4)
}
 0x48e   :  { %s461_s30 = smov [#allocation2]  }
 0x48f   :  { %358 = dma.smem_to_vmem %s461_s30, 16, %s356_s25, [#allocation3]  }
 0x490   :  { %456 = dma.done.wait [#allocation3], 16  }
 0x491   :  { %457 = vsyncadd [#allocation3], 4294967280 }
 0x492   :  { %362 = sfence }
 0x493   :  { %363 = vsyncpa [#allocation3], 1 }

// kernel: trip_dial_gpt2_forward.2
= control target key start
LH: loop header
LB: loop body
LE: loop exit
PB: predicated region body
PF: predicated region fallthrough
CT: control target
= control target key end

     0   :  { %s1970_s25 = smov 0   ;;  %s2254_s0 = inlined_call_operand.vmem [shape: f32[16,32], index: 0, kind: input, shape index: {}]   ;;  %s2255_s1 = inlined_call_operand.vmem [shape: f32[2,1,32], index: 1, kind: input, shape index: {}]   ;;  %s2256_s2 = inlined_call_operand.vmem [shape: f32[2,1,32], index: 2, kind: input, shape index: {}]   ;;  %s2257_s3 = inlined_call_operand.vmem [shape: bf16[2,32,96], index: 3, kind: input, shape index: {}]   ;;  %s2258_s4 = inlined_call_operand.vmem [shape: f32[2,1,96], index: 4, kind: input, shape index: {}]   ;;  %s2259_s5 = inlined_call_operand.vmem [shape: bf16[2,32,32], index: 5, kind: input, shape index: {}]   ;;  %s2260_s6 = inlined_call_operand.vmem [shape: f32[2,1,32], index: 6, kind: input, shape index: {}]   ;;  %s2261_s7 = inlined_call_operand.vmem [shape: f32[2,1,32], index: 7, kind: input, shape index: {}]   ;;  %s2262_s8 = inlined_call_operand.vmem [shape: f32[2,1,32], index: 8, kind: input, shape index: {}]   ;;  %s2263_s9 = inlined_call_operand.vmem [shape: bf16[2,32,128], index: 9, kind: input, shape index: {}]   ;;  %s2264_s10 = inlined_call_operand.vmem [shape: f32[2,1,128], index: 10, kind: input, shape index: {}]   ;;  %s2265_s11 = inlined_call_operand.vmem [shape: bf16[2,128,32], index: 11, kind: input, shape index: {}]   ;;  %s2266_s12 = inlined_call_operand.vmem [shape: f32[2,1,32], index: 12, kind: input, shape index: {}]   ;;  %s2267_s13 = inlined_call_operand.vmem [shape: f32[16,32], index: 13, kind: output, shape index: {}]  }
   0x1   :  { %2270 = sst [smem:[#allocation5_spill]] %s2256_s2 }
   0x2   :  { %2271 = sst [smem:[#allocation6_spill]] %s2257_s3 }
   0x3   :  { %2272 = sst [smem:[#allocation7_spill]] %s2259_s5 }
   0x4 LB: > { %2273 = sst [smem:[#allocation3_spill]] %s1890_s25  ;;  %s1648_s26 = sadd.s32 4294967295, %s1890_s25   ;;  %s1890_s25 = sphi %s1970_s25, %s23_s25  }
   0x5   : > { %p1651_p0 = scmp.ge.s32.totalorder %s1890_s25, 1  ;;  %p476_p1 = scmp.lt.s32.totalorder %s1890_s25, 3 }
   0x7   : > { %p477_p2 = pnand %p1651_p0, %p476_p1 }
   0x9   : > { %480 = sbr.rel (%p477_p2) target bundleno = 2967 (0xb97), region = 72 }
   0xe   : > { %p554_p3 = scmp.lt.s32.totalorder %s1648_s26, 1  ;;  %s2275_s3 = sld [smem:[#allocation6_spill]] }
   0xf   : > { %s2276_s5 = sld [smem:[#allocation7_spill]]  ;;  %p1660_p4 = scmp.ne.s32.totalorder %s1648_s26, 0 }
  0x10   : > { %s1978_s27 = scalar_select %p554_p3, %s1648_s26, 1 }
  0x12   : > { %s1696_s17 = sshll.u32 %s1978_s27, 4  ;;  %s578_s2 = scalar_lea.vmem %s2261_s7, %s1978_s27 }
  0x13   : > { %s581_s20 = scalar_lea.vmem %s2262_s8, %s1978_s27  ;;  %s597_s18 = scalar_lea.vmem %s2266_s12, %s1978_s27 }
  0x14   : > { %s1996_s23 = scalar_lea.vmem %s2275_s3, %s1696_s17  ;;  %s2018_s3 = scalar_lea.vmem %s2263_s9, %s1696_s17 }
  0x15   : > { %s2001_s29 = scalar_lea.vmem %s2276_s5, %s1696_s17  ;;  %s589_s5 = scalar_lea.vmem %s2264_s10, %s1978_s27 }
  0x16   : > { %2277 = sst [smem:[#allocation4_spill]] %s2001_s29  ;;  %s1699_s29 = sshll.u32 %s1978_s27, 6 }
  0x17   : > { %s2028_s14 = scalar_lea.vmem %s2265_s11, %s1699_s29  ;;  %602 = sbr.rel (%p1660_p4) target bundleno = 30 (0x1e), region = 76 }
  0x1c   : > { %v603_v0 = vld [vmem:[%s2254_s0] sm:$0xff]  ;;  %vm605_vm0 = vcmask 261120   ;;  %v604_v1 = vld [vmem:[%s2254_s0 + $0x8] sm:$0xff] }
  0x1d   : > { %606 = vst.msk [vmem:[%s2267_s13] sm:$0xff] %vm605_vm0, %v603_v0  ;;  %607 = vst.msk [vmem:[%s2267_s13 + $0x8] sm:$0xff] %vm605_vm0, %v604_v1 }
  0x1e PF: > { %vm612_vm1 = vcmask 261120   ;;  %v1842_v16 = vld [vmem:[%s1996_s23 + $0x8] sm:$0xff]   ;;  %v1892_v17 = vmov 0.0   ;;  %vm1893_vm2 = vmmov 0   ;;  %v1843_v18 = vld [vmem:[%s1996_s23] sm:$0xff]   ;;  %s2278_s21 = scalar_lea.vmem %s2255_s1, %s1978_s27  ;;  %s2279_s24 = sld [smem:[#allocation5_spill]]  ;;  %v724_v49 = vlaneseq }
  0x1f   : > { %1734 = vmatprep.subr.bf16.mxu0 %v1892_v17  ;;  %1738 = vmatprep.mubr.msk.bf16.mxu0 %vm1893_vm2, %v1892_v17  ;;  %v1661_v27 = vld [vmem:[%s2278_s21] ss:$0 sm:$0xff]  ;;  %s2281_s26 = scalar_lea.vmem %s2258_s4, %s1978_s27  ;;  %s1894_s30 = smov 96   ;;  %vm734_vm3 = vcmask 130048   ;;  %vm834_vm5 = vcmask 64512   ;;  %vm864_vm6 = vcmask 1043456  }
  0x20   : > { %1735 = vmatpush3.bf16.msra.mxu0 %v1842_v16  ;;  %1754 = vmatprep.subr.bf16.mxu1 %v1892_v17  ;;  %v1663_v36 = vld [vmem:[%s2281_s26] ss:$0 sm:$0xff]  ;;  %v2110_v50 = vshrl.u32 %v724_v49, 7  ;;  %v2112_v51 = vand.u32 127, %v724_v49  ;;  %s1895_s16 = smov 64   ;;  %s1896_s15 = smov 80  }
  0x21   : > { %1736 = vmatprep.subr.bf16.mxu0 %v1892_v17  ;;  %1756 = vmatprep.mubr.msk.bf16.mxu1 %vm1893_vm2, %v1892_v17  ;;  %s1897_s23 = smov 112   ;;  %s1898_s19 = smov 48   ;;  %vm1190_vm7 = vcmask 261248  }
  0x22   : > { %vm728_vm4 = vcmp.le.s32.totalorder %v2112_v51, %v2110_v50  ;;  %s2282_s21 = sld [smem:[#allocation4_spill]]  ;;  %s1899_s17 = smov 16  }
  0x24   : > { %v2049_v2 = vld [vmem:[%s2267_s13] sm:$0xff]  ;;  %v2054_v3 = vld [vmem:[%s2267_s13 + $0x8] sm:$0xff]  ;;  %1737 = vmatpush3.bf16.msra.mxu0 %v1843_v18  ;;  %s2280_s28 = scalar_lea.vmem %s2279_s24, %s1978_s27 }
  0x25   : > { %v613_v4 = vsel %vm612_vm1, %v2049_v2, 0.0  ;;  %v616_v5 = vsel %vm612_vm1, %v2054_v3, 0.0  ;;  %1742 = vmatprep.subr.bf16.mxu0 %v1892_v17  ;;  %v1662_v31 = vld [vmem:[%s2280_s28] ss:$0 sm:$0xff]  ;;  %s2283_s28 = scalar_lea.vmem %s2260_s6, %s1978_s27 }
  0x26   : > { %614 = vadd.xlane.f32.xlu0 %v613_v4 }
  0x2a   : > { %617 = vadd.xlane.f32.xlu0 %v616_v5 }
  0xaf   : > { %v615_v6 = vpop.xlane.xlu0 %614 }
  0xb0   : > { %v620_v7 = vmul.f32 0.03125, %v615_v6 }
  0xb2   : > { %v622_v8 = vsub.f32 %v2049_v2, %v620_v7 }
  0xb3   : > { %v618_v9 = vpop.xlane.xlu0 %617 }
  0xb4   : > { %v621_v10 = vmul.f32 0.03125, %v618_v9  ;;  %v624_v11 = vmul.f32 %v622_v8, %v622_v8 }
  0xb6   : > { %v623_v12 = vsub.f32 %v2054_v3, %v621_v10  ;;  %v626_v13 = vsel %vm612_vm1, %v624_v11, 0.0 }
  0xb7   : > { %627 = vadd.xlane.f32.xlu1 %v626_v13 }
  0xb8   : > { %v625_v14 = vmul.f32 %v623_v12, %v623_v12 }
  0xba   : > { %v629_v15 = vsel %vm612_vm1, %v625_v14, 0.0 }
  0xbb   : > { %630 = vadd.xlane.f32.xlu1 %v629_v15 }
 0x140   : > { %v628_v19 = vpop.xlane.xlu1 %627 }
 0x141   : > { %v632_v20 = vmul.f32 0.03125, %v628_v19 }
 0x143   : > { %v634_v21 = vadd.f32 1e-05, %v632_v20 }
 0x144   : > { %v631_v22 = vpop.xlane.xlu1 %630 }
 0x145   : > { %1856 = vrsqrt.f32 %v634_v21  ;;  %v633_v23 = vmul.f32 0.03125, %v631_v22 }
 0x147   : > { %v635_v24 = vadd.f32 1e-05, %v633_v23 }
 0x149   : > { %1858 = vrsqrt.f32 %v635_v24 }
 0x152   : > { %v1857_v25 = vpop.eup %1856 }
 0x153   : > { %v638_v26 = vmul.f32 %v1857_v25, %v622_v8 }
 0x155   : > { %v646_v30 = vmul.f32 %v1661_v27, %v638_v26 }
 0x156   : > { %v1859_v28 = vpop.eup %1858 }
 0x157   : > { %v639_v29 = vmul.f32 %v1859_v28, %v623_v12  ;;  %v654_v33 = vadd.f32 %v1662_v31, %v646_v30 }
 0x159   : > { %v647_v32 = vmul.f32 %v1661_v27, %v639_v29 }
 0x15b   : > { %v655_v34 = vadd.f32 %v1662_v31, %v647_v32 }
 0x15d   : > { %v656_v35 = vpack.c.bf16 %v655_v34, %v654_v33 }
 0x15f   : > { %1739 = vmatmul.mubr.msk.bf16.vlgmr.msra.gmra.mxu0 %vm612_vm1, %v656_v35 }
 0x160   : > { %1744 = vmatprep.mubr.msk.bf16.mxu0 %vm1893_vm2, %v1892_v17 }
 0x21f   : > { %v717_v37 = vpop.f32.mrf.mxu0 }
 0x220   : > { %v718_v38 = vadd.f32 %v1663_v36, %v717_v37 }
 0x221   : > { %v1740_v39 = vpop.f32.mrf.mxu0 }
 0x222   : > { %v2092_v40 = vpack.c.bf16 %v718_v38, %v718_v38 }
 0x223   : > { %v720_v41 = vpop.f32.mrf.mxu0 }
 0x224   : > { %v721_v42 = vadd.f32 %v1663_v36, %v720_v41  ;;  %732 = vrot.lane.b32.xlu0 %v2092_v40, %s1894_s30 }
 0x225   : > { %v1741_v43 = vpop.f32.mrf.mxu0 }
 0x226   : > { %v2095_v44 = vpack.c.bf16 %v721_v42, %v721_v42 }
 0x228   : > { %782 = vrot.lane.b32.xlu1 %v2095_v44, %s1894_s30 }
 0x296   : > { %v733_v45 = vpop.permute.xlu0 %732 }
 0x297   : > { %v739_v46 = vsel %vm734_vm3, %v733_v45, 0 }
 0x298   : > { %1743 = vmatpush3.bf16.xpose.msra.mxu0 %v739_v46 }
 0x299   : > { %1748 = vmatprep.subr.bf16.mxu0 %v1892_v17 }
 0x29a   : > { %v783_v47 = vpop.permute.xlu1 %782 }
 0x29b   : > { %v788_v48 = vsel %vm734_vm3, %v783_v47, 0 }
 0x29f   : > { %1745 = vmatmul.mubr.msk.bf16.vlgmr.msra.gmra.mxu0 %vm734_vm3, %v2092_v40 }
 0x2a0   : > { %1749 = vmatpush3.bf16.xpose.msra.mxu0 %v788_v48  ;;  %1750 = vmatprep.mubr.msk.bf16.mxu0 %vm1893_vm2, %v1892_v17 }
 0x2a1   : > { %1760 = vmatprep.subr.bf16.mxu0 %v1892_v17 }
 0x2a7   : > { %1751 = vmatmul.mubr.msk.bf16.vlgmr.msra.gmra.mxu0 %vm734_vm3, %v2095_v44 }
 0x2a8   : > { %1762 = vmatprep.mubr.msk.bf16.mxu0 %vm1893_vm2, %v1892_v17 }
 0x35f   : > { %v775_v52 = vpop.f32.mrf.mxu0 }
 0x360   : > { %v830_v53 = vmul.f32 0.25, %v775_v52 }
 0x361   : > { %v1746_v54 = vpop.f32.mrf.mxu0 }
 0x362   : > { %v832_v55 = vsel %vm728_vm4, %v830_v53, -1e+30 }
 0x363   : > { %v778_v56 = vpop.f32.mrf.mxu0  ;;  %v835_v57 = vsel %vm834_vm5, %v832_v55, -inf }
 0x364   : > { %836 = vmax.xlane.f32.xlu1 %v835_v57 }
 0x365   : > { %v1747_v58 = vpop.f32.mrf.mxu0 }
 0x367   : > { %v824_v59 = vpop.f32.mrf.mxu0 }
 0x368   : > { %v831_v60 = vmul.f32 0.25, %v824_v59 }
 0x369   : > { %v1752_v61 = vpop.f32.mrf.mxu0 }
 0x36a   : > { %v833_v62 = vsel %vm728_vm4, %v831_v60, -1e+30 }
 0x36b   : > { %v827_v63 = vpop.f32.mrf.mxu0  ;;  %v838_v0 = vsel %vm834_vm5, %v833_v62, -inf }
 0x36c   : > { %839 = vmax.xlane.f32.xlu0 %v838_v0 }
 0x36d   : > { %v1753_v1 = vpop.f32.mrf.mxu0 }
 0x375   : > { %908 = vrot.lane.b32.xlu1 %v2095_v44, %s1895_s16 }
 0x379   : > { %960 = vrot.lane.b32.xlu1 %v2092_v40, %s1896_s15 }
 0x3ed   : > { %v837_v4 = vpop.xlane.xlu1 %836 }
 0x3ee   : > { %v841_v5 = vsub.f32 %v832_v55, %v837_v4 }
 0x3f0   : > { %v843_v6 = vmul.f32 1.442695, %v841_v5 }
 0x3f1   : > { %v909_v7 = vpop.permute.xlu1 %908 }
 0x3f2   : > { %1860 = vpow2.f32 %v843_v6  ;;  %v914_v8 = vsel %vm864_vm6, %v909_v7, 0 }
 0x3f3   : > { %1761 = vmatpush3.bf16.msra.mxu0 %v914_v8 }
 0x3f4   : > { %1772 = vmatprep.subr.bf16.mxu0 %v1892_v17 }
 0x3f5   : > { %v840_v9 = vpop.xlane.xlu0 %839  ;;  %v961_v18 = vpop.permute.xlu1 %960 }
 0x3f6   : > { %v842_v10 = vsub.f32 %v833_v62, %v840_v9  ;;  %v966_v25 = vsel %vm734_vm3, %v961_v18, 0 }
 0x3f8   : > { %v845_v11 = vmul.f32 1.442695, %v842_v10 }
 0x3fa   : > { %1862 = vpow2.f32 %v845_v11 }
 0x3ff   : > { %v1861_v12 = vpop.eup %1860 }
 0x400   : > { %v847_v13 = vsel %vm834_vm5, %v1861_v12, 0.0 }
 0x401   : > { %848 = vadd.xlane.f32.xlu0 %v847_v13 }
 0x407   : > { %v1863_v14 = vpop.eup %1862 }
 0x408   : > { %v850_v15 = vsel %vm834_vm5, %v1863_v14, 0.0 }
 0x409   : > { %851 = vadd.xlane.f32.xlu1 %v850_v15  ;;  %v1844_v15 = vld [vmem:[%s2282_s21 + $0x8] sm:$0xff]  }
 0x417   : > { %859 = vrot.lane.b32.xlu0 %v2092_v40, %s1895_s16 }
 0x41a   : > { %1010 = vrot.lane.b32.xlu1 %v2095_v44, %s1896_s15 }
 0x41b   : > { %958 = vrot.lane.b32.xlu0 %v2092_v40, %s1897_s23 }
 0x41e   : > { %1008 = vrot.lane.b32.xlu1 %v2095_v44, %s1897_s23 }
 0x48a   : > { %v849_v16 = vpop.xlane.xlu0 %848 }
 0x48b   : > { %1864 = vrcp.f32 %v849_v16  ;;  %v1845_v16 = vld [vmem:[%s2282_s21] sm:$0xff]  }
 0x48e   : > { %v860_v19 = vpop.permute.xlu0 %859 }
 0x48f   : > { %v866_v20 = vsel %vm864_vm6, %v860_v19, 0 }
 0x490   : > { %1755 = vmatpush3.bf16.msra.mxu1 %v866_v20 }
 0x491   : > { %1766 = vmatprep.subr.bf16.mxu1 %v1892_v17 }
 0x492   : > { %v852_v21 = vpop.xlane.xlu1 %851  ;;  %v959_v30 = vpop.permute.xlu0 %958 }
 0x493   : > { %1866 = vrcp.f32 %v852_v21 }
 0x496   : > { %v1011_v28 = vpop.permute.xlu1 %1010 }
 0x497   : > { %v1016_v31 = vsel %vm734_vm3, %v1011_v28, 0 }
 0x498   : > { %v1865_v22 = vpop.eup %1864 }
 0x499   : > { %v855_v23 = vmul.f32 %v1865_v22, %v1861_v12 }
 0x49a   : > { %v1009_v32 = vpop.permute.xlu1 %1008 }
 0x49b   : > { %v857_v24 = vpack.c.bf16 %v855_v23, %v855_v23 }
 0x49d   : > { %1757 = vmatmul.mubr.msk.bf16.vlgmr.msra.gmra.mxu1 %vm834_vm5, %v857_v24 }
 0x49e   : > { %1767 = vmatpush3.bf16.xpose.msra.mxu1 %v966_v25  ;;  %1768 = vmatprep.mubr.msk.bf16.mxu1 %vm1893_vm2, %v1892_v17 }
 0x49f   : > { %1778 = vmatprep.subr.bf16.mxu1 %v1892_v17 }
 0x4a0   : > { %v1867_v26 = vpop.eup %1866 }
 0x4a1   : > { %v856_v27 = vmul.f32 %v1867_v26, %v1863_v14 }
 0x4a3   : > { %v858_v29 = vpack.c.bf16 %v856_v27, %v856_v27 }
 0x4a5   : > { %1763 = vmatmul.mubr.msk.bf16.vlgmr.msra.gmra.mxu0 %vm834_vm5, %v858_v29  ;;  %1769 = vmatmul.mubr.msk.bf16.vlgmr.msra.gmra.mxu1 %vm734_vm3, %v959_v30 }
 0x4a6   : > { %1773 = vmatpush3.bf16.xpose.msra.mxu0 %v1016_v31  ;;  %1774 = vmatprep.mubr.msk.bf16.mxu0 %vm1893_vm2, %v1892_v17  ;;  %v1675_v31 = vld [vmem:[%s2283_s28] ss:$0 sm:$0xff] }
 0x4a7   : > { %1784 = vmatprep.subr.bf16.mxu0 %v1892_v17  ;;  %1780 = vmatprep.mubr.msk.bf16.mxu1 %vm1893_vm2, %v1892_v17 }
 0x4ad   : > { %1775 = vmatmul.mubr.msk.bf16.vlgmr.msra.gmra.mxu0 %vm734_vm3, %v1009_v32 }
 0x4ae   : > { %1786 = vmatprep.mubr.msk.bf16.mxu0 %vm1893_vm2, %v1892_v17 }
 0x55d   : > { %v902_v33 = vpop.f32.mrf.mxu1 }
 0x55e   : > { %956 = vst.msk [vmem:[#allocation2] sm:$0xff] %vm734_vm3, %v902_v33 }
 0x55f   : > { %v1758_v34 = vpop.f32.mrf.mxu1 }
 0x561   : > { %v905_v35 = vpop.f32.mrf.mxu1 }
 0x563   : > { %v1759_v36 = vpop.f32.mrf.mxu1 }
 0x565   : > { %v950_v37 = vpop.f32.mrf.mxu0  ;;  %v1002_v38 = vpop.f32.mrf.mxu1 }
 0x566   : > { %957 = vst.msk [vmem:[#allocation2 + $0x8] sm:$0xff] %vm734_vm3, %v950_v37  ;;  %v1058_v39 = vmul.f32 0.25, %v1002_v38 }
 0x567   : > { %v1764_v41 = vpop.f32.mrf.mxu0  ;;  %v1770_v42 = vpop.f32.mrf.mxu1 }
 0x568   : > { %v1060_v43 = vsel %vm728_vm4, %v1058_v39, -1e+30 }
 0x569   : > { %v953_v45 = vpop.f32.mrf.mxu0  ;;  %v1005_v46 = vpop.f32.mrf.mxu1  ;;  %v1062_v47 = vsel %vm834_vm5, %v1060_v43, -inf }
 0x56a   : > { %1063 = vmax.xlane.f32.xlu0 %v1062_v47 }
 0x56b   : > { %v1765_v48 = vpop.f32.mrf.mxu0  ;;  %v1771_v49 = vpop.f32.mrf.mxu1 }
 0x56d   : > { %v1052_v52 = vpop.f32.mrf.mxu0 }
 0x56e   : > { %v1059_v53 = vmul.f32 0.25, %v1052_v52 }
 0x56f   : > { %v1776_v54 = vpop.f32.mrf.mxu0 }
 0x570   : > { %v1061_v55 = vsel %vm728_vm4, %v1059_v53, -1e+30  ;;  %v1846_v54 = vld [vmem:[%s2018_s3 + $0x8] sm:$0xff]  }
 0x571   : > { %v1055_v56 = vpop.f32.mrf.mxu0  ;;  %v1065_v57 = vsel %vm834_vm5, %v1061_v55, -inf }
 0x572   : > { %1066 = vmax.xlane.f32.xlu1 %v1065_v57 }
 0x573   : > { %v1777_v58 = vpop.f32.mrf.mxu0 }
 0x583   : > { %1134 = vrot.lane.b32.xlu1 %v2095_v44, %s1898_s19 }
 0x5f3   : > { %v1064_v59 = vpop.xlane.xlu0 %1063 }
 0x5f4   : > { %v1068_v60 = vsub.f32 %v1060_v43, %v1064_v59 }
 0x5f6   : > { %v1070_v61 = vmul.f32 1.442695, %v1068_v60 }
 0x5f8   : > { %1868 = vpow2.f32 %v1070_v61 }
 0x5fb   : > { %v1067_v62 = vpop.xlane.xlu1 %1066 }
 0x5fc   : > { %v1069_v63 = vsub.f32 %v1061_v55, %v1067_v62  ;;  %v1847_v55 = vld [vmem:[%s2018_s3] sm:$0xff]  }
 0x5fe   : > { %v1072_v0 = vmul.f32 1.442695, %v1069_v63 }
 0x5ff   : > { %v1135_v1 = vpop.permute.xlu1 %1134 }
 0x600   : > { %1870 = vpow2.f32 %v1072_v0  ;;  %v1140_v50 = vsel %vm864_vm6, %v1135_v1, 0  ;;  %v1679_v0 = vld [vmem:[%s578_s2] ss:$0 sm:$0xff] }
 0x601   : > { %1785 = vmatpush3.bf16.msra.mxu0 %v1140_v50 }
 0x602   : > { %1798 = vmatprep.subr.bf16.mxu0 %v1892_v17 }
 0x605   : > { %v1869_v51 = vpop.eup %1868 }
 0x606   : > { %v1074_v4 = vsel %vm834_vm5, %v1869_v51, 0.0 }
 0x607   : > { %1075 = vadd.xlane.f32.xlu0 %v1074_v4  ;;  %v1680_v4 = vld [vmem:[%s581_s20] ss:$0 sm:$0xff] }
 0x60d   : > { %v1871_v5 = vpop.eup %1870 }
 0x60e   : > { %v1077_v44 = vsel %vm834_vm5, %v1871_v5, 0.0 }
 0x60f   : > { %1078 = vadd.xlane.f32.xlu0 %v1077_v44 }
 0x625   : > { %1086 = vrot.lane.b32.xlu0 %v2092_v40, %s1898_s19 }
 0x690   : > { %v1076_v6 = vpop.xlane.xlu0 %1075 }
 0x691   : > { %1872 = vrcp.f32 %v1076_v6 }
 0x698   : > { %v1079_v7 = vpop.xlane.xlu0 %1078 }
 0x699   : > { %1874 = vrcp.f32 %v1079_v7 }
 0x69c   : > { %v1087_v8 = vpop.permute.xlu0 %1086 }
 0x69d   : > { %v1092_v9 = vsel %vm864_vm6, %v1087_v8, 0  ;;  %v1848_v8 = vld [vmem:[%s2028_s14 + $0x38] sm:$0xff]  }
 0x69e   : > { %v1873_v10 = vpop.eup %1872  ;;  %1779 = vmatpush3.bf16.msra.mxu1 %v1092_v9  ;;  %v1849_v9 = vld [vmem:[%s2028_s14 + $0x30] sm:$0xff]  }
 0x69f   : > { %v1082_v11 = vmul.f32 %v1873_v10, %v1869_v51  ;;  %1790 = vmatprep.subr.bf16.mxu1 %v1892_v17  ;;  %v1850_v10 = vld [vmem:[%s2028_s14 + $0x28] sm:$0xff]  }
 0x6a1   : > { %v1084_v12 = vpack.c.bf16 %v1082_v11, %v1082_v11  ;;  %v1851_v11 = vld [vmem:[%s2028_s14 + $0x20] sm:$0xff]  }
 0x6a3   : > { %1781 = vmatmul.mubr.msk.bf16.vlgmr.msra.gmra.mxu1 %vm834_vm5, %v1084_v12  ;;  %v1852_v12 = vld [vmem:[%s2028_s14 + $0x18] sm:$0xff]  }
 0x6a4   : > { %1794 = vmatprep.mubr.msk.bf16.mxu1 %vm1893_vm2, %v1892_v17  ;;  %1791 = vmatpush3.bf16.msra.mxu1 %v1844_v15  ;;  %v1681_v15 = vld [vmem:[%s589_s5] ss:$0 sm:$0xff] }
 0x6a5   : > { %1792 = vmatprep.subr.bf16.mxu1 %v1892_v17 }
 0x6a6   : > { %v1875_v40 = vpop.eup %1874 }
 0x6a7   : > { %v1083_v13 = vmul.f32 %v1875_v40, %v1871_v5  ;;  %v1853_v40 = vld [vmem:[%s2028_s14 + $0x10] sm:$0xff]  }
 0x6a8   : > { %1793 = vmatpush3.bf16.msra.mxu1 %v1845_v16 }
 0x6a9   : > { %v1085_v14 = vpack.c.bf16 %v1083_v13, %v1083_v13  ;;  %1806 = vmatprep.subr.bf16.mxu1 %v1892_v17  ;;  %v1854_v13 = vld [vmem:[%s2028_s14 + $0x8] sm:$0xff]  }
 0x6ab   : > { %1787 = vmatmul.mubr.msk.bf16.vlgmr.msra.gmra.mxu0 %vm834_vm5, %v1085_v14  ;;  %v1855_v14 = vld [vmem:[%s2028_s14] sm:$0xff]  }
 0x6ac   : > { %1802 = vmatprep.mubr.msk.bf16.mxu0 %vm1893_vm2, %v1892_v17  ;;  %1799 = vmatpush3.bf16.msra.mxu0 %v1846_v54 }
 0x6ad   : > { %1800 = vmatprep.subr.bf16.mxu0 %v1892_v17 }
 0x6b0   : > { %1801 = vmatpush3.bf16.msra.mxu0 %v1847_v55 }
 0x763   : > { %v1128_v18 = vpop.f32.mrf.mxu1 }
 0x764   : > { %1184 = vrot.lane.b32.xlu1 %v1128_v18, %s1899_s17 }
 0x765   : > { %v1782_v19 = vpop.f32.mrf.mxu1 }
 0x767   : > { %v1131_v20 = vpop.f32.mrf.mxu1 }
 0x769   : > { %v1783_v21 = vpop.f32.mrf.mxu1 }
 0x76b   : > { %v1176_v22 = vpop.f32.mrf.mxu0 }
 0x76c   : > { %1186 = vrot.lane.b32.xlu1 %v1176_v22, %s1899_s17 }
 0x76d   : > { %v1788_v23 = vpop.f32.mrf.mxu0 }
 0x76f   : > { %v1179_v24 = vpop.f32.mrf.mxu0 }
 0x771   : > { %v1789_v25 = vpop.f32.mrf.mxu0 }
 0x7d6   : > { %v1185_v26 = vpop.permute.xlu1 %1184 }
 0x7d7   : > { %1191 = vst.msk [vmem:[#allocation2] sm:$0xff] %vm1190_vm7, %v1185_v26 }
 0x7de   : > { %v1187_v27 = vpop.permute.xlu1 %1186  ;;  %v1193_v28 = vld [vmem:[#allocation2] sm:$0xff] }
 0x7df   : > { %1192 = vst.msk [vmem:[#allocation2 + $0x8] sm:$0xff] %vm1190_vm7, %v1187_v27 }
 0x7e6   : > { %v1194_v29 = vld [vmem:[#allocation2 + $0x8] sm:$0xff] }
 0x7e7   : > { %v1195_v30 = vpack.c.bf16 %v1194_v29, %v1193_v28 }
 0x7e9   : > { %1795 = vmatmul.mubr.msk.bf16.vlgmr.msra.gmra.mxu1 %vm612_vm1, %v1195_v30 }
 0x7ea   : > { %1822 = vmatprep.mubr.msk.bf16.mxu1 %vm1893_vm2, %v1892_v17  ;;  %1807 = vmatpush3.bf16.msra.mxu1 %v1848_v8 }
 0x7eb   : > { %1808 = vmatprep.subr.bf16.mxu1 %v1892_v17 }
 0x7ee   : > { %1809 = vmatpush3.bf16.msra.mxu1 %v1849_v9 }
 0x7ef   : > { %1810 = vmatprep.subr.bf16.mxu1 %v1892_v17 }
 0x7f2   : > { %1811 = vmatpush3.bf16.msra.mxu1 %v1850_v10 }
 0x7f3   : > { %1812 = vmatprep.subr.bf16.mxu1 %v1892_v17 }
 0x7f6   : > { %1813 = vmatpush3.bf16.msra.mxu1 %v1851_v11 }
 0x7f7   : > { %1814 = vmatprep.subr.bf16.mxu1 %v1892_v17 }
 0x7fa   : > { %1815 = vmatpush3.bf16.msra.mxu1 %v1852_v12 }
 0x7fb   : > { %1816 = vmatprep.subr.bf16.mxu1 %v1892_v17 }
 0x7fe   : > { %1817 = vmatpush3.bf16.msra.mxu1 %v1853_v40 }
 0x7ff   : > { %1818 = vmatprep.subr.bf16.mxu1 %v1892_v17 }
 0x802   : > { %1819 = vmatpush3.bf16.msra.mxu1 %v1854_v13 }
 0x803   : > { %1820 = vmatprep.subr.bf16.mxu1 %v1892_v17 }
 0x806   : > { %1821 = vmatpush3.bf16.msra.mxu1 %v1855_v14 }
 0x8a9   : > { %v1256_v32 = vpop.f32.mrf.mxu1 }
 0x8aa   : > { %v1257_v33 = vadd.f32 %v1675_v31, %v1256_v32 }
 0x8ab   : > { %v1796_v34 = vpop.f32.mrf.mxu1 }
 0x8ac   : > { %v2189_v35 = vadd.f32 %v1257_v33, %v2049_v2 }
 0x8ad   : > { %v1259_v36 = vpop.f32.mrf.mxu1 }
 0x8ae   : > { %v1260_v37 = vadd.f32 %v1675_v31, %v1259_v36  ;;  %v1267_v38 = vsel %vm612_vm1, %v2189_v35, 0.0 }
 0x8af   : > { %1268 = vadd.xlane.f32.xlu0 %v1267_v38  ;;  %v1797_v39 = vpop.f32.mrf.mxu1 }
 0x8b0   : > { %v2194_v41 = vadd.f32 %v1260_v37, %v2054_v3 }
 0x8b2   : > { %v1270_v42 = vsel %vm612_vm1, %v2194_v41, 0.0 }
 0x8b3   : > { %1271 = vadd.xlane.f32.xlu1 %v1270_v42 }
 0x938   : > { %v1269_v43 = vpop.xlane.xlu0 %1268 }
 0x939   : > { %v1273_v45 = vmul.f32 0.03125, %v1269_v43 }
 0x93b   : > { %v1275_v2 = vsub.f32 %v2189_v35, %v1273_v45  ;;  %v1685_v45 = vld [vmem:[%s597_s18] ss:$0 sm:$0xff] }
 0x93c   : > { %v1272_v46 = vpop.xlane.xlu1 %1271 }
 0x93d   : > { %v1274_v47 = vmul.f32 0.03125, %v1272_v46  ;;  %v1277_v48 = vmul.f32 %v1275_v2, %v1275_v2 }
 0x93f   : > { %v1276_v49 = vsub.f32 %v2194_v41, %v1274_v47  ;;  %v1279_v52 = vsel %vm612_vm1, %v1277_v48, 0.0 }
 0x940   : > { %1280 = vadd.xlane.f32.xlu0 %v1279_v52 }
 0x941   : > { %v1278_v53 = vmul.f32 %v1276_v49, %v1276_v49 }
 0x943   : > { %v1282_v3 = vsel %vm612_vm1, %v1278_v53, 0.0 }
 0x944   : > { %1283 = vadd.xlane.f32.xlu0 %v1282_v3 }
 0x9c9   : > { %v1281_v56 = vpop.xlane.xlu0 %1280 }
 0x9ca   : > { %v1285_v57 = vmul.f32 0.03125, %v1281_v56 }
 0x9cc   : > { %v1287_v58 = vadd.f32 1e-05, %v1285_v57 }
 0x9cd   : > { %v1284_v59 = vpop.xlane.xlu0 %1283 }
 0x9ce   : > { %1876 = vrsqrt.f32 %v1287_v58  ;;  %v1286_v60 = vmul.f32 0.03125, %v1284_v59 }
 0x9d0   : > { %v1288_v61 = vadd.f32 1e-05, %v1286_v60 }
 0x9d2   : > { %1878 = vrsqrt.f32 %v1288_v61 }
 0x9db   : > { %v1877_v62 = vpop.eup %1876 }
 0x9dc   : > { %v1291_v63 = vmul.f32 %v1877_v62, %v1275_v2 }
 0x9de   : > { %v1299_v51 = vmul.f32 %v1679_v0, %v1291_v63 }
 0x9df   : > { %v1879_v1 = vpop.eup %1878 }
 0x9e0   : > { %v1292_v50 = vmul.f32 %v1879_v1, %v1276_v49  ;;  %v1307_v44 = vadd.f32 %v1680_v4, %v1299_v51 }
 0x9e2   : > { %v1300_v5 = vmul.f32 %v1679_v0, %v1292_v50 }
 0x9e4   : > { %v1308_v6 = vadd.f32 %v1680_v4, %v1300_v5 }
 0x9e6   : > { %v1309_v7 = vpack.c.bf16 %v1308_v6, %v1307_v44 }
 0x9e8   : > { %1803 = vmatmul.mubr.msk.bf16.vlgmr.msra.gmra.mxu0 %vm612_vm1, %v1309_v7 }
 0xaa8   : > { %v1370_v16 = vpop.f32.mrf.mxu0 }
 0xaa9   : > { %v1371_v18 = vadd.f32 %v1681_v15, %v1370_v16 }
 0xaaa   : > { %v1804_v19 = vpop.f32.mrf.mxu0 }
 0xaab   : > { %v1379_v20 = vmul.f32 0.044715, %v1371_v18  ;;  %v1377_v36 = vmul.f32 0.5, %v1371_v18 }
 0xaac   : > { %v1373_v21 = vpop.f32.mrf.mxu0 }
 0xaad   : > { %v1381_v22 = vmul.f32 %v1379_v20, %v1371_v18  ;;  %v1374_v23 = vadd.f32 %v1681_v15, %v1373_v21 }
 0xaae   : > { %v1805_v24 = vpop.f32.mrf.mxu0 }
 0xaaf   : > { %v1383_v25 = vmul.f32 %v1381_v22, %v1371_v18  ;;  %v1380_v26 = vmul.f32 0.044715, %v1374_v23  ;;  %v1378_v37 = vmul.f32 0.5, %v1374_v23 }
 0xab1   : > { %v1385_v27 = vadd.f32 %v1383_v25, %v1371_v18  ;;  %v1382_v28 = vmul.f32 %v1380_v26, %v1374_v23 }
 0xab3   : > { %v1387_v29 = vmul.f32 0.7978846, %v1385_v27  ;;  %v1384_v17 = vmul.f32 %v1382_v28, %v1374_v23 }
 0xab5   : > { %1880 = vtanh.f32 %v1387_v29  ;;  %v1386_v30 = vadd.f32 %v1384_v17, %v1374_v23 }
 0xab7   : > { %v1388_v31 = vmul.f32 0.7978846, %v1386_v30 }
 0xab9   : > { %1882 = vtanh.f32 %v1388_v31 }
 0xac2   : > { %v1881_v32 = vpop.eup %1880 }
 0xac3   : > { %v1391_v33 = vadd.f32 1.0, %v1881_v32 }
 0xac5   : > { %v1393_v39 = vmul.f32 %v1391_v33, %v1377_v36 }
 0xac6   : > { %v1883_v34 = vpop.eup %1882 }
 0xac7   : > { %v1392_v38 = vadd.f32 1.0, %v1883_v34 }
 0xac9   : > { %v1394_v42 = vmul.f32 %v1392_v38, %v1378_v37 }
 0xacb   : > { %v1395_v43 = vpack.c.bf16 %v1394_v42, %v1393_v39 }
 0xacd   : > { %1823 = vmatmul.mubr.bf16.vlgmr.msra.gmra.mxu1 %v1395_v43 }
 0xb8d   : > { %v1501_v2 = vpop.f32.mrf.mxu1 }
 0xb8e   : > { %v1502_v46 = vadd.f32 %v1685_v45, %v1501_v2 }
 0xb8f   : > { %v1824_v47 = vpop.f32.mrf.mxu1 }
 0xb90   : > { %v1508_v48 = vadd.f32 %v1502_v46, %v2189_v35 }
 0xb91   : > { %v1504_v49 = vpop.f32.mrf.mxu1 }
 0xb92   : > { %1510 = vst.msk [vmem:[%s2267_s13] sm:$0xff] %vm612_vm1, %v1508_v48  ;;  %v1505_v52 = vadd.f32 %v1685_v45, %v1504_v49 }
 0xb93   : > { %v1825_v53 = vpop.f32.mrf.mxu1 }
 0xb94   : > { %v1509_v3 = vadd.f32 %v1505_v52, %v2194_v41 }
 0xb96   : > { %1511 = vst.msk [vmem:[%s2267_s13 + $0x8] sm:$0xff] %vm612_vm1, %v1509_v3 }
 0xb97 PF: > { %s2284_s27 = sld [smem:[#allocation3_spill]] }
 0xb9d   : > { %s23_s25 = sadd.s32 1, %s2284_s27  }
 0xb9e   : > { %p20_p5 = scmp.ge.s32.totalorder %s23_s25, 4  }
 0xba0   :  { %22 = sbr.rel (!%p20_p5) target bundleno = 4 (0x4), region = 135 }

</bundles_post_ra>
